<compile_context>
chip_gen: v5e
topology: v5e:2x2
jax: 0.10.0
libtpu: 0.0.40
codegen_flags: <defaults>
</compile_context>

<pallas_src>
import jax
import jax.numpy as jnp
import numpy as np
from jax.experimental import pallas as pl
from jax.experimental.pallas import tpu as pltpu


# ---------------------------------------------------------------------------
# Fused kernel: router + routing + expert SwiGLU + combine + hook statistics
# ---------------------------------------------------------------------------
def _fused_moe_kernel(x_ref, wr_ref, wgu_ref, wd_ref,
                      final_ref, logits_ref, counts_ref, wsum_ref,
                      in_l2_ref, hit_ref, out_l2_ref,
                      x16_ref, cw_ref, mask_ref):
    e = pl.program_id(0)
    E = mask_ref.shape[-1]

    # ------------------ routing + routing-only stats (once) ------------------
    @pl.when(e == 0)
    def _router_and_stats():
        x = x_ref[...]                                              # (T, H) f32
        x16_ref[...] = x.astype(jnp.bfloat16)                       # cached bf16 copy

        # Router kept in f32: tiny (H x E) matmul, and expert selection must
        # match the f32 reference exactly.
        logits = jnp.dot(x, wr_ref[...], preferred_element_type=jnp.float32)
        logits_ref[...] = logits

        # softmax over experts (f32), divide via EUP reciprocal
        m = jnp.max(logits, axis=-1, keepdims=True)
        ex = jnp.exp(logits - m)
        denom = jnp.sum(ex, axis=-1, keepdims=True)
        rw = ex * pl.reciprocal(denom, approx=True)                 # (T, E)

        # top-1 / top-2 with index tie-break (matches torch.argmax / lax.top_k)
        idx = jax.lax.broadcasted_iota(jnp.int32, rw.shape, 1)
        m1 = jnp.max(rw, axis=-1, keepdims=True)
        first1 = jnp.min(jnp.where(rw >= m1, idx, E), axis=-1, keepdims=True)
        mask1 = (idx == first1).astype(jnp.float32)

        rw2 = jnp.where(mask1 > 0.5, -1e30, rw)
        m2 = jnp.max(rw2, axis=-1, keepdims=True)
        first2 = jnp.min(jnp.where(rw2 >= m2, idx, E), axis=-1, keepdims=True)
        mask2 = (idx == first2).astype(jnp.float32)

        topk_mask = mask1 + mask2                                   # exactly 2 ones/row
        mask_ref[...] = topk_mask
        cw_ref[...] = topk_mask * rw        # norm_topk_prob=False -> unnormalized

        # MoE-layer hook: top-1 expert counts and routing-weight sums
        counts_ref[...] = jnp.sum(mask1, axis=0, keepdims=True)     # (1, E)
        wsum_ref[...] = jnp.sum(mask1 * rw, axis=0, keepdims=True)  # (1, E)

        # Expert hook input stats: mean ||x||_2 over routed tokens, hit flag
        xn = jnp.sqrt(jnp.sum(x * x, axis=-1, keepdims=True))       # (T, 1)
        cnt = jnp.sum(topk_mask, axis=0, keepdims=True)             # (1, E)
        in_sum = jnp.sum(topk_mask * xn, axis=0, keepdims=True)     # (1, E)
        safe = jnp.maximum(cnt, 1.0)
        in_l2_ref[...] = jnp.where(
            cnt > 0, in_sum * pl.reciprocal(safe, approx=True), 0.0)
        hit_ref[...] = (cnt > 0).astype(jnp.float32)

        # init accumulators (output blocks stay resident across the expert grid)
        final_ref[...] = jnp.zeros_like(final_ref)
        out_l2_ref[...] = jnp.zeros_like(out_l2_ref)

    # ------------------ per-expert SwiGLU (bf16 MXU, f32 accumulate) ---------
    x16 = x16_ref[...]                                              # (T, H) bf16
    gu = jnp.dot(x16, wgu_ref[0], preferred_element_type=jnp.float32)  # (T, 2I)
    I = gu.shape[-1] // 2
    g = gu[:, :I]
    u = gu[:, I:]
    h = (g * jax.nn.sigmoid(g) * u).astype(jnp.bfloat16)            # SiLU(g) * u
    out = jnp.dot(h, wd_ref[0], preferred_element_type=jnp.float32)    # (T, H)

    # extract this expert's routing columns with a one-hot lane reduction
    onehot = (jax.lax.broadcasted_iota(jnp.int32, (1, E), 1) == e
              ).astype(jnp.float32)                                 # (1, E)
    cw_col = jnp.sum(cw_ref[...] * onehot, axis=-1, keepdims=True)      # (T, 1)
    mask_col = jnp.sum(mask_ref[...] * onehot, axis=-1, keepdims=True)  # (T, 1)

    final_ref[...] += cw_col * out

    # Expert hook output stat: mean ||expert_out||_2 over routed tokens
    onorm = jnp.sqrt(jnp.sum(out * out, axis=-1, keepdims=True))    # (T, 1)
    cnt_e = jnp.sum(mask_col, axis=0, keepdims=True)                # (1, 1)
    out_sum_e = jnp.sum(mask_col * onorm, axis=0, keepdims=True)    # (1, 1)
    safe_e = jnp.maximum(cnt_e, 1.0)
    val_e = jnp.where(cnt_e > 0, out_sum_e / safe_e, 0.0)           # (1, 1)
    out_l2_ref[...] += onehot * val_e


def _fused_forward(xt, w_router, wgu16, wd16):
    T, H = xt.shape
    E = w_router.shape[1]
    I2 = wgu16.shape[-1]
    I = wd16.shape[1]

    out_shapes = (
        jax.ShapeDtypeStruct((T, H), jnp.float32),   # final hidden states
        jax.ShapeDtypeStruct((T, E), jnp.float32),   # router logits
        jax.ShapeDtypeStruct((1, E), jnp.float32),   # top-1 expert counts
        jax.ShapeDtypeStruct((1, E), jnp.float32),   # top-1 routing-weight sums
        jax.ShapeDtypeStruct((1, E), jnp.float32),   # per-expert mean input L2
        jax.ShapeDtypeStruct((1, E), jnp.float32),   # per-expert hit flag
        jax.ShapeDtypeStruct((1, E), jnp.float32),   # per-expert mean output L2
    )
    return pl.pallas_call(
        _fused_moe_kernel,
        out_shape=out_shapes,
        grid=(E,),
        in_specs=[
            pl.BlockSpec((T, H), lambda e: (0, 0)),        # x (resident)
            pl.BlockSpec((H, E), lambda e: (0, 0)),        # router weights
            pl.BlockSpec((1, H, I2), lambda e: (e, 0, 0)),  # fused gate||up (bf16)
            pl.BlockSpec((1, I, H), lambda e: (e, 0, 0)),   # down proj (bf16)
        ],
        out_specs=(
            pl.BlockSpec((T, H), lambda e: (0, 0)),        # accumulator
            pl.BlockSpec((T, E), lambda e: (0, 0)),
            pl.BlockSpec((1, E), lambda e: (0, 0)),
            pl.BlockSpec((1, E), lambda e: (0, 0)),
            pl.BlockSpec((1, E), lambda e: (0, 0)),
            pl.BlockSpec((1, E), lambda e: (0, 0)),
            pl.BlockSpec((1, E), lambda e: (0, 0)),
        ),
        scratch_shapes=[
            pltpu.VMEM((T, H), jnp.bfloat16),   # bf16 copy of x (matmul input)
            pltpu.VMEM((T, E), jnp.float32),    # combine weights (top-k * rw)
            pltpu.VMEM((T, E), jnp.float32),    # top-k 0/1 mask
        ],
        compiler_params=pltpu.CompilerParams(
            dimension_semantics=("arbitrary",),          # expert axis = reduction
            vmem_limit_bytes=48 * 1024 * 1024,
        ),
    )(xt, w_router, wgu16, wd16)


@jax.jit
def olmoe_forward_with_stats(x, w_router, wgu16, wd16):
    B, S, H = x.shape
    xt = x.reshape(B * S, H).astype(jnp.float32)
    final, logits, counts, wsum, in_l2, hit, out_l2 = _fused_forward(
        xt, w_router, wgu16, wd16)
    stats = {
        "expert_counts": counts[0],
        "expert_weights_sum": wsum[0],
        "expert_input_l2_sum": in_l2[0],
        "expert_output_l2_sum": out_l2[0],
        "expert_input_count": hit[0],
    }
    return final.reshape(B, S, H), logits, stats


class OlmoeImportanceWrapperPallas:
    """JAX/Pallas port of OlmoeImportanceWrapper around one OlmoeSparseMoeBlock."""

    def __init__(self, hidden_size, intermediate_size, num_experts, key):
        ks = jax.random.split(key, 4)
        scale = 0.02
        self.params = {
            "w_router": scale * jax.random.normal(
                ks[0], (hidden_size, num_experts), jnp.float32),
            "wg": scale * jax.random.normal(
                ks[1], (num_experts, hidden_size, intermediate_size), jnp.float32),
            "wu": scale * jax.random.normal(
                ks[2], (num_experts, hidden_size, intermediate_size), jnp.float32),
            "wd": scale * jax.random.normal(
                ks[3], (num_experts, intermediate_size, hidden_size), jnp.float32),
        }
        # bf16, gate||up-fused copies fed to the kernel (halve weight DMA,
        # bf16-native MXU); f32 masters kept in self.params for the reference.
        self._wgu16 = jnp.concatenate(
            [self.params["wg"], self.params["wu"]], axis=-1).astype(jnp.bfloat16)
        self._wd16 = self.params["wd"].astype(jnp.bfloat16)

        z = jnp.zeros((num_experts,), jnp.float32)
        self.expert_counts = z
        self.expert_weights_sum = z
        self.expert_input_l2_sum = z
        self.expert_input_count = z
        self.expert_output_l2_sum = z

    def __call__(self, x):
        final, logits, stats = olmoe_forward_with_stats(
            x, self.params["w_router"], self._wgu16, self._wd16)
        # hook-style accumulation into running state
        self.expert_counts = self.expert_counts + stats["expert_counts"]
        self.expert_weights_sum = self.expert_weights_sum + stats["expert_weights_sum"]
        self.expert_input_l2_sum = self.expert_input_l2_sum + stats["expert_input_l2_sum"]
        self.expert_output_l2_sum = self.expert_output_l2_sum + stats["expert_output_l2_sum"]
        self.expert_input_count = self.expert_input_count + stats["expert_input_count"]
        return final, logits


# ---------------------------------------------------------------------------
# Pure-JAX reference (for correctness check)
# ---------------------------------------------------------------------------
def reference_forward(x, params, top_k=2):
    B, S, H = x.shape
    xt = x.reshape(-1, H).astype(jnp.float32)
    w_router, wg, wu, wd = (params["w_router"], params["wg"],
                            params["wu"], params["wd"])
    E = w_router.shape[1]
    logits = xt @ w_router
    rw = jax.nn.softmax(logits, axis=-1)
    top_v, top_i = jax.lax.top_k(rw, top_k)
    cw = jnp.sum(jax.nn.one_hot(top_i, E) * top_v[..., None], axis=1)    # (T,E)

    g = jnp.einsum("th,ehi->eti", xt, wg)
    u = jnp.einsum("th,ehi->eti", xt, wu)
    h = jax.nn.silu(g) * u
    out = jnp.einsum("eti,eih->eth", h, wd)                              # (E,T,H)
    final = jnp.einsum("te,eth->th", cw, out).reshape(B, S, H)

    sel = jnp.argmax(rw, axis=-1)
    oh1 = jax.nn.one_hot(sel, E)
    counts = oh1.sum(0)
    wsum = (oh1 * rw).sum(0)

    topk_mask = (cw > 0).astype(jnp.float32)
    xn = jnp.linalg.norm(xt, axis=-1)                                    # (T,)
    onorm = jnp.linalg.norm(out, axis=-1)                                # (E,T)
    cnt = topk_mask.sum(0)
    safe = jnp.maximum(cnt, 1.0)
    in_l2 = jnp.where(cnt > 0, (topk_mask * xn[:, None]).sum(0) / safe, 0.0)
    out_l2 = jnp.where(cnt > 0, (topk_mask * onorm.T).sum(0) / safe, 0.0)
    hit = (cnt > 0).astype(jnp.float32)
    stats = {
        "expert_counts": counts,
        "expert_weights_sum": wsum,
        "expert_input_l2_sum": in_l2,
        "expert_output_l2_sum": out_l2,
        "expert_input_count": hit,
    }
    return final, logits, stats


if __name__ == "__main__":
    B, S, H, I, E = 2, 8, 128, 128, 8
    key = jax.random.PRNGKey(0)
    k_x, k_p = jax.random.split(key)
    x = jax.random.normal(k_x, (B, S, H), dtype=jnp.float32)

    wrapper = OlmoeImportanceWrapperPallas(H, I, E, key=k_p)
    final, logits = wrapper(x)
    jax.block_until_ready(final)
    jax.block_until_ready(logits)

    # correctness check vs pure-JAX f32 reference
    ref_final, ref_logits, ref_stats = reference_forward(x, wrapper.params)
    assert np.allclose(np.asarray(final), np.asarray(ref_final),
                       rtol=1e-2, atol=1e-2)
    assert np.allclose(np.asarray(logits), np.asarray(ref_logits),
                       rtol=1e-2, atol=1e-2)
    assert np.allclose(np.asarray(wrapper.expert_counts),
                       np.asarray(ref_stats["expert_counts"]), atol=1e-3)
    assert np.allclose(np.asarray(wrapper.expert_weights_sum),
                       np.asarray(ref_stats["expert_weights_sum"]),
                       rtol=1e-2, atol=1e-2)
    assert np.allclose(np.asarray(wrapper.expert_input_l2_sum),
                       np.asarray(ref_stats["expert_input_l2_sum"]),
                       rtol=1e-2, atol=1e-2)
    assert np.allclose(np.asarray(wrapper.expert_output_l2_sum),
                       np.asarray(ref_stats["expert_output_l2_sum"]),
                       rtol=1e-2, atol=1e-2)
    assert np.allclose(np.asarray(wrapper.expert_input_count),
                       np.asarray(ref_stats["expert_input_count"]), atol=1e-3)

    print("KERNEL_OK")
</pallas_src>

<mosaic_0001>
module attributes {stable_mosaic.version = 11 : i64} {
  func.func @_fused_moe_kernel(%arg0: i32, %arg1: memref<16x128xf32, #tpu.memory_space<vmem>>, %arg2: memref<128x8xf32, #tpu.memory_space<vmem>>, %arg3: memref<1x128x256xbf16, #tpu.memory_space<vmem>>, %arg4: memref<1x128x128xbf16, #tpu.memory_space<vmem>>, %arg5: memref<16x128xf32, #tpu.memory_space<vmem>>, %arg6: memref<16x8xf32, #tpu.memory_space<vmem>>, %arg7: memref<1x8xf32, #tpu.memory_space<vmem>>, %arg8: memref<1x8xf32, #tpu.memory_space<vmem>>, %arg9: memref<1x8xf32, #tpu.memory_space<vmem>>, %arg10: memref<1x8xf32, #tpu.memory_space<vmem>>, %arg11: memref<1x8xf32, #tpu.memory_space<vmem>>, %arg12: memref<16x128xbf16, #tpu.memory_space<vmem>>, %arg13: memref<16x8xf32, #tpu.memory_space<vmem>>, %arg14: memref<16x8xf32, #tpu.memory_space<vmem>>) attributes {dimension_semantics = [#tpu.dimension_semantics<arbitrary>], iteration_bounds = array<i64: 8>, scalar_prefetch = 0 : i64, scratch_operands = 3 : i64, tpu.core_type = #tpu.core_type<tc>, window_params = [{pipeline_mode = #tpu.pipeline_mode<synchronous>, transform_indices = @transform_0, window_bounds = array<i64: 16, 128>}, {pipeline_mode = #tpu.pipeline_mode<synchronous>, transform_indices = @transform_1, window_bounds = array<i64: 128, 8>}, {transform_indices = @transform_2, window_bounds = array<i64: 1, 128, 256>}, {transform_indices = @transform_3, window_bounds = array<i64: 1, 128, 128>}, {pipeline_mode = #tpu.pipeline_mode<synchronous>, transform_indices = @transform_4, window_bounds = array<i64: 16, 128>}, {pipeline_mode = #tpu.pipeline_mode<synchronous>, transform_indices = @transform_5, window_bounds = array<i64: 16, 8>}, {pipeline_mode = #tpu.pipeline_mode<synchronous>, transform_indices = @transform_6, window_bounds = array<i64: 1, 8>}, {pipeline_mode = #tpu.pipeline_mode<synchronous>, transform_indices = @transform_7, window_bounds = array<i64: 1, 8>}, {pipeline_mode = #tpu.pipeline_mode<synchronous>, transform_indices = @transform_8, window_bounds = array<i64: 1, 8>}, {pipeline_mode = #tpu.pipeline_mode<synchronous>, transform_indices = @transform_9, window_bounds = array<i64: 1, 8>}, {pipeline_mode = #tpu.pipeline_mode<synchronous>, transform_indices = @transform_10, window_bounds = array<i64: 1, 8>}]} {
    %c0_i32 = arith.constant 0 : i32
    %0 = arith.cmpi eq, %arg0, %c0_i32 : i32
    %1 = arith.extui %0 : i1 to i32
    %c0_i32_0 = arith.constant 0 : i32
    %2 = arith.cmpi ne, %1, %c0_i32_0 : i32
    scf.if %2 {
      %c0_30 = arith.constant 0 : index
      %c0_31 = arith.constant 0 : index
      %61 = vector.load %arg1[%c0_30, %c0_31] : memref<16x128xf32, #tpu.memory_space<vmem>>, vector<16x128xf32>
      %62 = arith.truncf %61 : vector<16x128xf32> to vector<16x128xbf16>
      %c0_32 = arith.constant 0 : index
      %c0_33 = arith.constant 0 : index
      %63 = vector.load %arg12[%c0_32, %c0_33] : memref<16x128xbf16, #tpu.memory_space<vmem>>, vector<16x128xbf16>
      tpu.vector_store %arg12[%c0_32, %c0_33], %62 {strides = array<i32>} : memref<16x128xbf16, #tpu.memory_space<vmem>>, vector<16x128xbf16>,
      %c0_34 = arith.constant 0 : index
      %c0_35 = arith.constant 0 : index
      %64 = vector.load %arg2[%c0_34, %c0_35] : memref<128x8xf32, #tpu.memory_space<vmem>>, vector<128x8xf32>
      %cst_36 = arith.constant dense<0.000000e+00> : vector<16x8xf32>
      %65 = tpu.matmul %61, %64, %cst_36 {dimension_numbers = #tpu.dot_dimension_numbers<[1], [0], [0], [1], [0, 0, 1, 1], [], []>} : vector<16x128xf32>, vector<128x8xf32>, vector<16x8xf32> -> vector<16x8xf32>
      %c0_37 = arith.constant 0 : index
      %c0_38 = arith.constant 0 : index
      %66 = vector.load %arg6[%c0_37, %c0_38] : memref<16x8xf32, #tpu.memory_space<vmem>>, vector<16x8xf32>
      tpu.vector_store %arg6[%c0_37, %c0_38], %65 {strides = array<i32>} : memref<16x8xf32, #tpu.memory_space<vmem>>, vector<16x8xf32>,
      %cst_39 = arith.constant dense<0xFF800000> : vector<16xf32>
      %67 = vector.multi_reduction <maximumf>, %65, %cst_39 [1] : vector<16x8xf32> to vector<16xf32>
      %68 = vector.shape_cast %67 : vector<16xf32> to vector<16x1xf32>
      %69 = vector.broadcast %68 : vector<16x1xf32> to vector<16x8xf32>
      %70 = arith.subf %65, %69 : vector<16x8xf32>
      %71 = math.exp %70 : vector<16x8xf32>
      %cst_40 = arith.constant dense<0.000000e+00> : vector<16xf32>
      %72 = vector.multi_reduction <add>, %71, %cst_40 [1] : vector<16x8xf32> to vector<16xf32>
      %73 = vector.shape_cast %72 : vector<16xf32> to vector<16x1xf32>
      %74 = tpu.reciprocal %73 {approx = true} : vector<16x1xf32> -> vector<16x1xf32>
      %75 = vector.broadcast %74 : vector<16x1xf32> to vector<16x8xf32>
      %76 = arith.mulf %71, %75 : vector<16x8xf32>
      %77 = tpu.iota {dimensions = array<i32: 1>} : vector<16x8xi32>
      %cst_41 = arith.constant dense<0xFF800000> : vector<16xf32>
      %78 = vector.multi_reduction <maximumf>, %76, %cst_41 [1] : vector<16x8xf32> to vector<16xf32>
      %79 = vector.shape_cast %78 : vector<16xf32> to vector<16x1xf32>
      %80 = vector.broadcast %79 : vector<16x1xf32> to vector<16x8xf32>
      %81 = arith.cmpf oge, %76, %80 : vector<16x8xf32>
      %c8_i32 = arith.constant 8 : i32
      %82 = vector.broadcast %c8_i32 : i32 to vector<16x8xi32>
      %83 = arith.select %81, %77, %82 : vector<16x8xi1>, vector<16x8xi32>
      %cst_42 = arith.constant dense<2147483647> : vector<16xi32>
      %84 = vector.multi_reduction <minsi>, %83, %cst_42 [1] : vector<16x8xi32> to vector<16xi32>
      %85 = vector.shape_cast %84 : vector<16xi32> to vector<16x1xi32>
      %86 = vector.broadcast %85 : vector<16x1xi32> to vector<16x8xi32>
      %87 = arith.cmpi eq, %77, %86 : vector<16x8xi32>
      %88 = arith.extui %87 : vector<16x8xi1> to vector<16x8xi32>
      %89 = arith.sitofp %88 : vector<16x8xi32> to vector<16x8xf32>
      %cst_43 = arith.constant 5.000000e-01 : f32
      %90 = vector.broadcast %cst_43 : f32 to vector<16x8xf32>
      %91 = arith.cmpf ogt, %89, %90 : vector<16x8xf32>
      %cst_44 = arith.constant -1.000000e+30 : f32
      %92 = vector.broadcast %cst_44 : f32 to vector<16x8xf32>
      %93 = arith.select %91, %92, %76 : vector<16x8xi1>, vector<16x8xf32>
      %cst_45 = arith.constant dense<0xFF800000> : vector<16xf32>
      %94 = vector.multi_reduction <maximumf>, %93, %cst_45 [1] : vector<16x8xf32> to vector<16xf32>
      %95 = vector.shape_cast %94 : vector<16xf32> to vector<16x1xf32>
      %96 = vector.broadcast %95 : vector<16x1xf32> to vector<16x8xf32>
      %97 = arith.cmpf oge, %93, %96 : vector<16x8xf32>
      %c8_i32_46 = arith.constant 8 : i32
      %98 = vector.broadcast %c8_i32_46 : i32 to vector<16x8xi32>
      %99 = arith.select %97, %77, %98 : vector<16x8xi1>, vector<16x8xi32>
      %cst_47 = arith.constant dense<2147483647> : vector<16xi32>
      %100 = vector.multi_reduction <minsi>, %99, %cst_47 [1] : vector<16x8xi32> to vector<16xi32>
      %101 = vector.shape_cast %100 : vector<16xi32> to vector<16x1xi32>
      %102 = vector.broadcast %101 : vector<16x1xi32> to vector<16x8xi32>
      %103 = arith.cmpi eq, %77, %102 : vector<16x8xi32>
      %104 = arith.extui %103 : vector<16x8xi1> to vector<16x8xi32>
      %105 = arith.sitofp %104 : vector<16x8xi32> to vector<16x8xf32>
      %106 = arith.addf %89, %105 : vector<16x8xf32>
      %c0_48 = arith.constant 0 : index
      %c0_49 = arith.constant 0 : index
      %107 = vector.load %arg14[%c0_48, %c0_49] : memref<16x8xf32, #tpu.memory_space<vmem>>, vector<16x8xf32>
      tpu.vector_store %arg14[%c0_48, %c0_49], %106 {strides = array<i32>} : memref<16x8xf32, #tpu.memory_space<vmem>>, vector<16x8xf32>,
      %108 = arith.mulf %106, %76 : vector<16x8xf32>
      %c0_50 = arith.constant 0 : index
      %c0_51 = arith.constant 0 : index
      %109 = vector.load %arg13[%c0_50, %c0_51] : memref<16x8xf32, #tpu.memory_space<vmem>>, vector<16x8xf32>
      tpu.vector_store %arg13[%c0_50, %c0_51], %108 {strides = array<i32>} : memref<16x8xf32, #tpu.memory_space<vmem>>, vector<16x8xf32>,
      %cst_52 = arith.constant dense<0.000000e+00> : vector<8xf32>
      %110 = vector.multi_reduction <add>, %89, %cst_52 [0] : vector<16x8xf32> to vector<8xf32>
      %111 = vector.shape_cast %110 : vector<8xf32> to vector<1x8xf32>
      %c0_53 = arith.constant 0 : index
      %c0_54 = arith.constant 0 : index
      %112 = vector.load %arg7[%c0_53, %c0_54] : memref<1x8xf32, #tpu.memory_space<vmem>>, vector<1x8xf32>
      tpu.vector_store %arg7[%c0_53, %c0_54], %111 {strides = array<i32>} : memref<1x8xf32, #tpu.memory_space<vmem>>, vector<1x8xf32>,
      %113 = arith.mulf %89, %76 : vector<16x8xf32>
      %cst_55 = arith.constant dense<0.000000e+00> : vector<8xf32>
      %114 = vector.multi_reduction <add>, %113, %cst_55 [0] : vector<16x8xf32> to vector<8xf32>
      %115 = vector.shape_cast %114 : vector<8xf32> to vector<1x8xf32>
      %c0_56 = arith.constant 0 : index
      %c0_57 = arith.constant 0 : index
      %116 = vector.load %arg8[%c0_56, %c0_57] : memref<1x8xf32, #tpu.memory_space<vmem>>, vector<1x8xf32>
      tpu.vector_store %arg8[%c0_56, %c0_57], %115 {strides = array<i32>} : memref<1x8xf32, #tpu.memory_space<vmem>>, vector<1x8xf32>,
      %117 = arith.mulf %61, %61 : vector<16x128xf32>
      %cst_58 = arith.constant dense<0.000000e+00> : vector<16xf32>
      %118 = vector.multi_reduction <add>, %117, %cst_58 [1] : vector<16x128xf32> to vector<16xf32>
      %119 = vector.shape_cast %118 : vector<16xf32> to vector<16x1xf32>
      %120 = math.sqrt %119 : vector<16x1xf32>
      %cst_59 = arith.constant dense<0.000000e+00> : vector<8xf32>
      %121 = vector.multi_reduction <add>, %106, %cst_59 [0] : vector<16x8xf32> to vector<8xf32>
      %122 = vector.shape_cast %121 : vector<8xf32> to vector<1x8xf32>
      %123 = vector.broadcast %120 : vector<16x1xf32> to vector<16x8xf32>
      %124 = arith.mulf %106, %123 : vector<16x8xf32>
      %cst_60 = arith.constant dense<0.000000e+00> : vector<8xf32>
      %125 = vector.multi_reduction <add>, %124, %cst_60 [0] : vector<16x8xf32> to vector<8xf32>
      %126 = vector.shape_cast %125 : vector<8xf32> to vector<1x8xf32>
      %cst_61 = arith.constant 1.000000e+00 : f32
      %127 = vector.broadcast %cst_61 : f32 to vector<1x8xf32>
      %128 = arith.maximumf %122, %127 : vector<1x8xf32>
      %cst_62 = arith.constant 0.000000e+00 : f32
      %129 = vector.broadcast %cst_62 : f32 to vector<1x8xf32>
      %130 = arith.cmpf ogt, %122, %129 : vector<1x8xf32>
      %131 = tpu.reciprocal %128 {approx = true} : vector<1x8xf32> -> vector<1x8xf32>
      %132 = arith.mulf %126, %131 : vector<1x8xf32>
      %cst_63 = arith.constant 0.000000e+00 : f32
      %133 = vector.broadcast %cst_63 : f32 to vector<1x8xf32>
      %134 = arith.select %130, %132, %133 : vector<1x8xi1>, vector<1x8xf32>
      %c0_64 = arith.constant 0 : index
      %c0_65 = arith.constant 0 : index
      %135 = vector.load %arg9[%c0_64, %c0_65] : memref<1x8xf32, #tpu.memory_space<vmem>>, vector<1x8xf32>
      tpu.vector_store %arg9[%c0_64, %c0_65], %134 {strides = array<i32>} : memref<1x8xf32, #tpu.memory_space<vmem>>, vector<1x8xf32>,
      %cst_66 = arith.constant 0.000000e+00 : f32
      %136 = vector.broadcast %cst_66 : f32 to vector<1x8xf32>
      %137 = arith.cmpf ogt, %122, %136 : vector<1x8xf32>
      %138 = arith.extui %137 : vector<1x8xi1> to vector<1x8xi32>
      %139 = arith.sitofp %138 : vector<1x8xi32> to vector<1x8xf32>
      %c0_67 = arith.constant 0 : index
      %c0_68 = arith.constant 0 : index
      %140 = vector.load %arg10[%c0_67, %c0_68] : memref<1x8xf32, #tpu.memory_space<vmem>>, vector<1x8xf32>
      tpu.vector_store %arg10[%c0_67, %c0_68], %139 {strides = array<i32>} : memref<1x8xf32, #tpu.memory_space<vmem>>, vector<1x8xf32>,
      %cst_69 = arith.constant 0.000000e+00 : f32
      %141 = vector.broadcast %cst_69 : f32 to vector<16x128xf32>
      %c0_70 = arith.constant 0 : index
      %c0_71 = arith.constant 0 : index
      %142 = vector.load %arg5[%c0_70, %c0_71] : memref<16x128xf32, #tpu.memory_space<vmem>>, vector<16x128xf32>
      tpu.vector_store %arg5[%c0_70, %c0_71], %141 {strides = array<i32>} : memref<16x128xf32, #tpu.memory_space<vmem>>, vector<16x128xf32>,
      %cst_72 = arith.constant 0.000000e+00 : f32
      %143 = vector.broadcast %cst_72 : f32 to vector<1x8xf32>
      %c0_73 = arith.constant 0 : index
      %c0_74 = arith.constant 0 : index
      %144 = vector.load %arg11[%c0_73, %c0_74] : memref<1x8xf32, #tpu.memory_space<vmem>>, vector<1x8xf32>
      tpu.vector_store %arg11[%c0_73, %c0_74], %143 {strides = array<i32>} : memref<1x8xf32, #tpu.memory_space<vmem>>, vector<1x8xf32>,
    } else {
    }
    %c0 = arith.constant 0 : index
    %c0_1 = arith.constant 0 : index
    %3 = vector.load %arg12[%c0, %c0_1] : memref<16x128xbf16, #tpu.memory_space<vmem>>, vector<16x128xbf16>
    %c0_2 = arith.constant 0 : index
    %c0_3 = arith.constant 0 : index
    %c0_4 = arith.constant 0 : index
    %4 = vector.load %arg3[%c0_2, %c0_3, %c0_4] : memref<1x128x256xbf16, #tpu.memory_space<vmem>>, vector<1x128x256xbf16>
    %5 = vector.shape_cast %4 : vector<1x128x256xbf16> to vector<128x256xbf16>
    %cst = arith.constant dense<0.000000e+00> : vector<16x256xf32>
    %6 = tpu.matmul %3, %5, %cst {dimension_numbers = #tpu.dot_dimension_numbers<[1], [0], [0], [1], [0, 0, 1, 1], [], []>} : vector<16x128xbf16>, vector<128x256xbf16>, vector<16x256xf32> -> vector<16x256xf32>
    %7 = vector.extract_strided_slice %6 {offsets = [0, 0], sizes = [16, 128], strides = [1, 1]} : vector<16x256xf32> to vector<16x128xf32>
    %8 = vector.extract_strided_slice %6 {offsets = [0, 128], sizes = [16, 128], strides = [1, 1]} : vector<16x256xf32> to vector<16x128xf32>
    %9 = arith.negf %7 : vector<16x128xf32>
    %10 = math.exp %9 : vector<16x128xf32>
    %cst_5 = arith.constant 1.000000e+00 : f32
    %11 = vector.broadcast %cst_5 : f32 to vector<16x128xf32>
    %12 = arith.addf %11, %10 : vector<16x128xf32>
    %13 = arith.divf %11, %12 : vector<16x128xf32>
    %14 = arith.mulf %7, %13 : vector<16x128xf32>
    %15 = arith.mulf %14, %8 : vector<16x128xf32>
    %16 = arith.truncf %15 : vector<16x128xf32> to vector<16x128xbf16>
    %c0_6 = arith.constant 0 : index
    %c0_7 = arith.constant 0 : index
    %c0_8 = arith.constant 0 : index
    %17 = vector.load %arg4[%c0_6, %c0_7, %c0_8] : memref<1x128x128xbf16, #tpu.memory_space<vmem>>, vector<1x128x128xbf16>
    %18 = vector.shape_cast %17 : vector<1x128x128xbf16> to vector<128x128xbf16>
    %cst_9 = arith.constant dense<0.000000e+00> : vector<16x128xf32>
    %19 = tpu.matmul %16, %18, %cst_9 {dimension_numbers = #tpu.dot_dimension_numbers<[1], [0], [0], [1], [0, 0, 1, 1], [], []>} : vector<16x128xbf16>, vector<128x128xbf16>, vector<16x128xf32> -> vector<16x128xf32>
    %20 = tpu.iota {dimensions = array<i32: 1>} : vector<1x8xi32>
    %21 = vector.broadcast %arg0 : i32 to vector<1x8xi32>
    %22 = arith.cmpi eq, %20, %21 : vector<1x8xi32>
    %23 = arith.extui %22 : vector<1x8xi1> to vector<1x8xi32>
    %24 = arith.sitofp %23 : vector<1x8xi32> to vector<1x8xf32>
    %c0_10 = arith.constant 0 : index
    %c0_11 = arith.constant 0 : index
    %25 = vector.load %arg13[%c0_10, %c0_11] : memref<16x8xf32, #tpu.memory_space<vmem>>, vector<16x8xf32>
    %26 = vector.broadcast %24 : vector<1x8xf32> to vector<16x8xf32>
    %27 = arith.mulf %25, %26 : vector<16x8xf32>
    %cst_12 = arith.constant dense<0.000000e+00> : vector<16xf32>
    %28 = vector.multi_reduction <add>, %27, %cst_12 [1] : vector<16x8xf32> to vector<16xf32>
    %29 = vector.shape_cast %28 : vector<16xf32> to vector<16x1xf32>
    %c0_13 = arith.constant 0 : index
    %c0_14 = arith.constant 0 : index
    %30 = vector.load %arg14[%c0_13, %c0_14] : memref<16x8xf32, #tpu.memory_space<vmem>>, vector<16x8xf32>
    %31 = vector.broadcast %24 : vector<1x8xf32> to vector<16x8xf32>
    %32 = arith.mulf %30, %31 : vector<16x8xf32>
    %cst_15 = arith.constant dense<0.000000e+00> : vector<16xf32>
    %33 = vector.multi_reduction <add>, %32, %cst_15 [1] : vector<16x8xf32> to vector<16xf32>
    %34 = vector.shape_cast %33 : vector<16xf32> to vector<16x1xf32>
    %c0_16 = arith.constant 0 : index
    %c0_17 = arith.constant 0 : index
    %35 = vector.load %arg5[%c0_16, %c0_17] : memref<16x128xf32, #tpu.memory_space<vmem>>, vector<16x128xf32>
    %36 = vector.broadcast %29 : vector<16x1xf32> to vector<16x128xf32>
    %37 = arith.mulf %36, %19 : vector<16x128xf32>
    %38 = arith.addf %35, %37 : vector<16x128xf32>
    %c0_18 = arith.constant 0 : index
    %c0_19 = arith.constant 0 : index
    %39 = vector.load %arg5[%c0_18, %c0_19] : memref<16x128xf32, #tpu.memory_space<vmem>>, vector<16x128xf32>
    tpu.vector_store %arg5[%c0_18, %c0_19], %38 {strides = array<i32>} : memref<16x128xf32, #tpu.memory_space<vmem>>, vector<16x128xf32>,
    %40 = arith.mulf %19, %19 : vector<16x128xf32>
    %cst_20 = arith.constant dense<0.000000e+00> : vector<16xf32>
    %41 = vector.multi_reduction <add>, %40, %cst_20 [1] : vector<16x128xf32> to vector<16xf32>
    %42 = vector.shape_cast %41 : vector<16xf32> to vector<16x1xf32>
    %43 = math.sqrt %42 : vector<16x1xf32>
    %cst_21 = arith.constant dense<0.000000e+00> : vector<1xf32>
    %44 = vector.multi_reduction <add>, %34, %cst_21 [0] : vector<16x1xf32> to vector<1xf32>
    %45 = vector.shape_cast %44 : vector<1xf32> to vector<1x1xf32>
    %46 = arith.mulf %34, %43 : vector<16x1xf32>
    %cst_22 = arith.constant dense<0.000000e+00> : vector<1xf32>
    %47 = vector.multi_reduction <add>, %46, %cst_22 [0] : vector<16x1xf32> to vector<1xf32>
    %48 = vector.shape_cast %47 : vector<1xf32> to vector<1x1xf32>
    %cst_23 = arith.constant 1.000000e+00 : f32
    %49 = vector.broadcast %cst_23 : f32 to vector<1x1xf32>
    %50 = arith.maximumf %45, %49 : vector<1x1xf32>
    %cst_24 = arith.constant 0.000000e+00 : f32
    %51 = vector.broadcast %cst_24 : f32 to vector<1x1xf32>
    %52 = arith.cmpf ogt, %45, %51 : vector<1x1xf32>
    %53 = arith.divf %48, %50 : vector<1x1xf32>
    %cst_25 = arith.constant 0.000000e+00 : f32
    %54 = vector.broadcast %cst_25 : f32 to vector<1x1xf32>
    %55 = arith.select %52, %53, %54 : vector<1x1xi1>, vector<1x1xf32>
    %c0_26 = arith.constant 0 : index
    %c0_27 = arith.constant 0 : index
    %56 = vector.load %arg11[%c0_26, %c0_27] : memref<1x8xf32, #tpu.memory_space<vmem>>, vector<1x8xf32>
    %57 = vector.broadcast %55 : vector<1x1xf32> to vector<1x8xf32>
    %58 = arith.mulf %24, %57 : vector<1x8xf32>
    %59 = arith.addf %56, %58 : vector<1x8xf32>
    %c0_28 = arith.constant 0 : index
    %c0_29 = arith.constant 0 : index
    %60 = vector.load %arg11[%c0_28, %c0_29] : memref<1x8xf32, #tpu.memory_space<vmem>>, vector<1x8xf32>
    tpu.vector_store %arg11[%c0_28, %c0_29], %59 {strides = array<i32>} : memref<1x8xf32, #tpu.memory_space<vmem>>, vector<1x8xf32>,
    return
  }
  func.func @transform_0(%arg0: i32) -> (i32, i32) {
    %c0_i32 = arith.constant 0 : i32
    %c0_i32_0 = arith.constant 0 : i32
    %c0_i32_1 = arith.constant 0 : i32
    return %c0_i32, %c0_i32_0 : i32, i32
  }
  func.func @transform_1(%arg0: i32) -> (i32, i32) {
    %c0_i32 = arith.constant 0 : i32
    %c0_i32_0 = arith.constant 0 : i32
    %c0_i32_1 = arith.constant 0 : i32
    return %c0_i32, %c0_i32_0 : i32, i32
  }
  func.func @transform_2(%arg0: i32) -> (i32, i32, i32) {
    %c0_i32 = arith.constant 0 : i32
    %c0_i32_0 = arith.constant 0 : i32
    %c0_i32_1 = arith.constant 0 : i32
    return %arg0, %c0_i32, %c0_i32_0 : i32, i32, i32
  }
  func.func @transform_3(%arg0: i32) -> (i32, i32, i32) {
    %c0_i32 = arith.constant 0 : i32
    %c0_i32_0 = arith.constant 0 : i32
    %c0_i32_1 = arith.constant 0 : i32
    return %arg0, %c0_i32, %c0_i32_0 : i32, i32, i32
  }
  func.func @transform_4(%arg0: i32) -> (i32, i32) {
    %c0_i32 = arith.constant 0 : i32
    %c0_i32_0 = arith.constant 0 : i32
    %c0_i32_1 = arith.constant 0 : i32
    return %c0_i32, %c0_i32_0 : i32, i32
  }
  func.func @transform_5(%arg0: i32) -> (i32, i32) {
    %c0_i32 = arith.constant 0 : i32
    %c0_i32_0 = arith.constant 0 : i32
    %c0_i32_1 = arith.constant 0 : i32
    return %c0_i32, %c0_i32_0 : i32, i32
  }
  func.func @transform_6(%arg0: i32) -> (i32, i32) {
    %c0_i32 = arith.constant 0 : i32
    %c0_i32_0 = arith.constant 0 : i32
    %c0_i32_1 = arith.constant 0 : i32
    return %c0_i32, %c0_i32_0 : i32, i32
  }
  func.func @transform_7(%arg0: i32) -> (i32, i32) {
    %c0_i32 = arith.constant 0 : i32
    %c0_i32_0 = arith.constant 0 : i32
    %c0_i32_1 = arith.constant 0 : i32
    return %c0_i32, %c0_i32_0 : i32, i32
  }
  func.func @transform_8(%arg0: i32) -> (i32, i32) {
    %c0_i32 = arith.constant 0 : i32
    %c0_i32_0 = arith.constant 0 : i32
    %c0_i32_1 = arith.constant 0 : i32
    return %c0_i32, %c0_i32_0 : i32, i32
  }
  func.func @transform_9(%arg0: i32) -> (i32, i32) {
    %c0_i32 = arith.constant 0 : i32
    %c0_i32_0 = arith.constant 0 : i32
    %c0_i32_1 = arith.constant 0 : i32
    return %c0_i32, %c0_i32_0 : i32, i32
  }
  func.func @transform_10(%arg0: i32) -> (i32, i32) {
    %c0_i32 = arith.constant 0 : i32
    %c0_i32_0 = arith.constant 0 : i32
    %c0_i32_1 = arith.constant 0 : i32
    return %c0_i32, %c0_i32_0 : i32, i32
  }
}

</mosaic_0001>

<bundles_post_ra>
// kernel: olmoe_forward_with_stats.1
= control target key start
LH: loop header
LB: loop body
LE: loop exit
PB: predicated region body
PF: predicated region fallthrough
CT: control target
= control target key end

     0   :  { %s2264_s0 = inlined_call_operand.vmem [shape: f32[16,128], index: 0, kind: input, shape index: {}]   ;;  %s2265_s1 = inlined_call_operand.vmem [shape: f32[128,8], index: 1, kind: input, shape index: {}]   ;;  %s2266_s2 = inlined_call_operand.hbm [shape: bf16[8,128,256], index: 2, kind: input, shape index: {}]   ;;  %s2267_s3 = inlined_call_operand.hbm [shape: bf16[8,128,128], index: 3, kind: input, shape index: {}]   ;;  %s2268_s4 = inlined_call_operand.hbm [shape: f32[16,128], index: 4, kind: output, shape index: {0}]   ;;  %s2269_s5 = inlined_call_operand.vmem [shape: f32[16,8], index: 5, kind: output, shape index: {1}]   ;;  %s2270_s6 = inlined_call_operand.hbm [shape: f32[1,8], index: 6, kind: output, shape index: {2}]   ;;  %s2271_s7 = inlined_call_operand.hbm [shape: f32[1,8], index: 7, kind: output, shape index: {3}]   ;;  %s2272_s8 = inlined_call_operand.hbm [shape: f32[1,8], index: 8, kind: output, shape index: {4}]   ;;  %s2273_s9 = inlined_call_operand.hbm [shape: f32[1,8], index: 9, kind: output, shape index: {5}]   ;;  %s2274_s10 = inlined_call_operand.hbm [shape: f32[1,8], index: 10, kind: output, shape index: {6}]  }
   0x1   :  { %2278 = sst [smem:[#allocation28_spill]] %s2266_s2 }
   0x2   :  { %16 = vsyncpa [#allocation6], 0 }
   0x3   :  { %18 = vsyncpa [#allocation6 + $0x1], 0 }
   0x4   :  { %19 = vsyncpa [#allocation9], 0 }
   0x5   :  { %21 = vsyncpa [#allocation9 + $0x1], 0 }
   0x6   :  { %22 = vsyncpa [#allocation7], 0 }
   0x7   :  { %23 = vsyncpa [#allocation12], 0 }
   0x8   :  { %24 = vsyncpa [#allocation15], 0 }
   0x9   :  { %25 = vsyncpa [#allocation18], 0  ;;  %s1884_s13 = smov 0   ;;  %s1886_s14 = smov 0  }
   0xa   :  { %s1888_s15 = smov 0   ;;  %s1890_s16 = smov 0  }
   0xb LB: > { %2279 = sst [smem:[#allocation25_spill]] %s1809_s15  ;;  %s1903_s17 = sadd.s32 4294967295, %s1813_s16   ;;  %s1813_s16 = sphi %s1890_s16, %s2287_s16   ;;  %s1809_s15 = sphi %s1888_s15, %s2289_s15   ;;  %s1805_s14 = sphi %s1886_s14, %s2291_s14   ;;  %s1801_s13 = sphi %s1884_s13, %s2290_s13  }
   0xc   : > { %s1906_s18 = sadd.s32 1, %s1813_s16   ;;  %s80_s20 = sadd.s32 1, %s1809_s15 }
   0xd   : > { %2280 = sst [smem:[#allocation26_spill]] %s1906_s18  ;;  %s77_s19 = ssub.s32 %s1813_s16, %s1906_s18 }
   0xe   : > { %p78_p0 = scmp.eq.s32.totalorder %s77_s19, 0  ;;  %p87_p1 = scmp.ne.s32.totalorder %s1809_s15, %s1805_s14 }
   0xf   : > { %p88_p2 = scmp.eq.s32.totalorder %s1813_s16, 0  ;;  %p93_p3 = scmp.ne.s32.totalorder %s1805_s14, %s1801_s13 }
  0x10   : > { %s1916_s21 = scalar_select %p78_p0, %s1809_s15, %s80_s20  }
  0x11   : > { %p1918_p4 = por %p88_p2, %p87_p1  ;;  %p94_p5 = scmp.eq.s32.totalorder %s1903_s17, 0 }
  0x12   : > { %2281 = sst [smem:[#allocation27_spill]] %s1916_s21  ;;  %p1444_p6 = scmp.lt.s32.totalorder %s1813_s16, 8 }
  0x13   : > { %p1924_p7 = por %p94_p5, %p93_p3  ;;  %s1929_s24 = sand.u32 1, %s1809_s15  }
  0x14   : > { %s1229_s25 = sshll.u32 %s1929_s24, 7  ;;  %s1361_s26 = sshll.u32 %s1813_s16, 7 }
  0x15   : > { %s2284_s2 = sld [smem:[#allocation28_spill]]  ;;  %s300_s30 = scalar_lea.vmem [#allocation5], %s1229_s25 }
  0x16   : > { %s308_s11 = sshll.u32 %s300_s30, 4  ;;  %p1938_p8 = pnand %p1444_p6, %p1918_p4  ;;  %s309_s11 = int_to_ptr.vmem [resolvable:$true] %s308_s11 }
  0x17   : > { %p1235_p9 = scmp.ge.s32.totalorder %s1813_s16, 1  ;;  %s297_s19 = scalar_lea.sflag [#allocation6], %s1929_s24 }
  0x18   : > { %p1535_p11 = pneg %p1938_p8 }
  0x1b   : > { %s305_s29 = scalar_lea.hbm %s2284_s2, %s1361_s26  ;;  %s1538_s26 = scalar_lea.hbm %s2284_s2, 1024 }
  0x1c   : > { %s306_s12 = sshll.u32 %s305_s29, 4  ;;  %s307_s12 = int_to_ptr.hbm [resolvable:$true] %s306_s12 }
  0x1d   : > { %s1531_s20 = sshra.s32 %s307_s12, 4  ;;  %s1532_s20 = int_to_ptr.hbm [resolvable:$true] %s1531_s20 }
  0x1e   : > { %s1533_s21 = scalar_lea.hbm %s1532_s20, 128  ;;  %p1539_p0 = scmp.lt.s32.totalorder %s1532_s20, %s2284_s2 }
  0x1f   : > { %p1534_p10 = scmp.ne.s32.totalorder %s1532_s20, %s1533_s21  ;;  %p1540_p1 = scmp.lt.s32.totalorder %s1538_s26, %s1533_s21 }
  0x21   : > { %p1536_p12 = pnand %p1535_p11, %p1534_p10  ;;  %p1541_p2 = por %p1540_p1, %p1539_p0 }
  0x23   : > { %p1537_p13 = pneg %p1536_p12 }
  0x25   : > { %p1542_p3 = pnand %p1541_p2, %p1537_p13 }
  0x27   : > { %1545 = shalt.err (!%p1542_p3)
}
  0x28   : > { %s1815_s29 = smov 128   ;;  %s1816_s30 = smov 8  }
  0x29   : > { %1440 = dma.hbm_to_vmem [thread:$0]  (!%p1938_p8), %s307_s12, 2048, %s309_s11, %s297_s19, %s1815_s29, %s1815_s29, %s1816_s30  }
  0x2a   : > { %p338_p4 = scmp.lt.s32.totalorder %s1813_s16, 9  ;;  %s1232_s25 = sshll.u32 %s1929_s24, 6 }
  0x2b   : > { %s1362_s22 = sshll.u32 %s1813_s16, 6  ;;  %s322_s28 = scalar_lea.vmem [#allocation8], %s1232_s25 }
  0x2c   : > { %p1962_p5 = pnand %p1235_p9, %p338_p4  ;;  %s327_s27 = scalar_lea.hbm %s2267_s3, %s1362_s22 }
  0x2d   : > { %s330_s2 = sshll.u32 %s322_s28, 4  ;;  %s328_s15 = sshll.u32 %s327_s27, 4  ;;  %s331_s2 = int_to_ptr.vmem [resolvable:$true] %s330_s2  ;;  %s329_s15 = int_to_ptr.hbm [resolvable:$true] %s328_s15 }
  0x2e   : > { %s319_s18 = scalar_lea.sflag [#allocation9], %s1929_s24  ;;  %s1561_s11 = sshra.s32 %s329_s15, 4  ;;  %s1562_s11 = int_to_ptr.hbm [resolvable:$true] %s1561_s11 }
  0x2f   : > { %s1563_s12 = scalar_lea.hbm %s1562_s11, 64  ;;  %s1568_s29 = scalar_lea.hbm %s2267_s3, 512 }
  0x30   : > { %p1564_p6 = scmp.ne.s32.totalorder %s1562_s11, %s1563_s12  ;;  %p1569_p12 = scmp.lt.s32.totalorder %s1562_s11, %s2267_s3 }
  0x31   : > { %p1570_p13 = scmp.lt.s32.totalorder %s1568_s29, %s1563_s12 }
  0x32   : > { %p1566_p9 = pnand %p1564_p6, %p1535_p11 }
  0x33   : > { %p1571_p0 = por %p1570_p13, %p1569_p12 }
  0x34   : > { %p1567_p10 = pneg %p1566_p9 }
  0x36   : > { %p1572_p1 = pnand %p1571_p0, %p1567_p10 }
  0x38   : > { %1575 = shalt.err (!%p1572_p1)
}
  0x39   : > { %s1817_s24 = smov 64   ;;  %s1818_s25 = smov 4  }
  0x3a   : > { %1443 = dma.hbm_to_vmem [thread:$0]  (!%p1938_p8), %s329_s15, 1024, %s331_s2, %s319_s18, %s1817_s24, %s1817_s24, %s1818_s25  }
  0x3b   : > { %342 = sbr.rel (%p1962_p5) target bundleno = 1769 (0x6e9), region = 36  ;;  %s344_s20 = sand.u32 (!%p1962_p5), 1, %s1805_s14  }
  0x3c   : > { %s1236_s26 = sshll.u32 (!%p1962_p5), %s344_s20, 7  ;;  %s345_s27 = scalar_lea.sflag (!%p1962_p5), [#allocation6], %s344_s20 }
  0x3d   : > { %s1984_s28 = scalar_lea.vmem (!%p1962_p5), [#allocation5], %s1236_s26 }
  0x40   : > { %1776 = dma.done.wait (%p1924_p7), %s345_s27, 2048  }
  0x41   : > { %1778 = vsyncadd (%p1924_p7), %s345_s27, 4294965248  ;;  %s1237_s11 = sshll.u32 %s344_s20, 6  ;;  %s355_s12 = scalar_lea.sflag [#allocation9], %s344_s20 }
  0x42   : > { %s1990_s13 = scalar_lea.vmem [#allocation8], %s1237_s11 }
  0x43   : > { %1780 = dma.done.wait (%p1924_p7), %s355_s12, 1024  }
  0x44   : > { %1782 = vsyncadd (%p1924_p7), %s355_s12, 4294966272  ;;  %p1238_p8 = scmp.ne.s32.totalorder %s1903_s17, 0 }
  0x46   : > { %399 = sbr.rel (%p1238_p8) target bundleno = 1255 (0x4e7), region = 48 }
  0x4b   : > { %v421_v0 = vld [vmem:[%s2265_s1 + $0x78] sm:$0xff]  ;;  %v420_v1 = vld [vmem:[%s2265_s1 + $0x70] sm:$0xff]  ;;  %v419_v2 = vld [vmem:[%s2265_s1 + $0x68] sm:$0xff]  ;;  %vm445_vm0 = vcmask 64512   ;;  %v470_v41 = vlaneseq  ;;  %v1819_v53 = vmov 0.0   ;;  %vm585_vm5 = vcmask 57344  }
  0x4c   : > { %422 = vmatpush.msra.mxu0 %v421_v0  ;;  %1393 = vmatpush.msra.mxu1 %v421_v0  ;;  %v418_v3 = vld [vmem:[%s2265_s1 + $0x60] sm:$0xff]  ;;  %v2017_v5 = vld [vmem:[%s2264_s0 + $0x8] sm:$0xff]  ;;  %v417_v6 = vld [vmem:[%s2265_s1 + $0x58] sm:$0xff]  ;;  %658 = vst [vmem:[#allocation10] sm:$0xff] %v1819_v53 }
  0x4d   : > { %v2012_v4 = vld [vmem:[%s2264_s0] sm:$0xff]  ;;  %v416_v8 = vld [vmem:[%s2265_s1 + $0x50] sm:$0xff]  ;;  %v415_v9 = vld [vmem:[%s2265_s1 + $0x48] sm:$0xff]  ;;  %v2079_v42 = vand.u32 127, %v470_v41  ;;  %659 = vst [vmem:[#allocation10 + $0x8] sm:$0xff] %v1819_v53 }
  0x4e   : > { %423 = vmatpush.msra.mxu0 %v420_v1  ;;  %1394 = vmatpush.msra.mxu1 %v420_v1  ;;  %v1391_v7 = vpack.c.bf16 %v2017_v5, %v2012_v4  ;;  %v414_v10 = vld [vmem:[%s2265_s1 + $0x40] sm:$0xff]  ;;  %v413_v11 = vld [vmem:[%s2265_s1 + $0x38] sm:$0xff]  ;;  %v412_v12 = vld [vmem:[%s2265_s1 + $0x30] sm:$0xff]  ;;  %660 = vst.msk [vmem:[#allocation17] sm:$0x1] %vm585_vm5, %v1819_v53 }
  0x4f   : > { %v411_v13 = vld [vmem:[%s2265_s1 + $0x28] sm:$0xff]  ;;  %v410_v14 = vld [vmem:[%s2265_s1 + $0x20] sm:$0xff]  ;;  %v409_v15 = vld [vmem:[%s2265_s1 + $0x18] sm:$0xff] }
  0x50   : > { %424 = vmatpush.msra.mxu0 %v419_v2  ;;  %1395 = vmatpush.msra.mxu1 %v419_v2  ;;  %1392 = vst [vmem:[#allocation2] sm:$0xff] %v1391_v7   ;;  %v408_v16 = vld [vmem:[%s2265_s1 + $0x10] sm:$0xff]  ;;  %v407_v17 = vld [vmem:[%s2265_s1 + $0x8] sm:$0xff]  ;;  %v406_v18 = vld [vmem:[%s2265_s1] sm:$0xff] }
  0x52   : > { %425 = vmatpush.msra.mxu0 %v418_v3  ;;  %1396 = vmatpush.msra.mxu1 %v418_v3 }
  0x54   : > { %426 = vmatpush.msra.mxu0 %v417_v6  ;;  %1397 = vmatpush.msra.mxu1 %v417_v6 }
  0x56   : > { %427 = vmatpush.msra.mxu0 %v416_v8  ;;  %1398 = vmatpush.msra.mxu1 %v416_v8 }
  0x58   : > { %428 = vmatpush.msra.mxu0 %v415_v9  ;;  %1399 = vmatpush.msra.mxu1 %v415_v9 }
  0x5a   : > { %429 = vmatpush.msra.mxu0 %v414_v10  ;;  %1400 = vmatpush.msra.mxu1 %v414_v10 }
  0x5c   : > { %430 = vmatpush.msra.mxu0 %v413_v11  ;;  %1401 = vmatpush.msra.mxu1 %v413_v11 }
  0x5e   : > { %431 = vmatpush.msra.mxu0 %v412_v12  ;;  %1402 = vmatpush.msra.mxu1 %v412_v12 }
  0x60   : > { %432 = vmatpush.msra.mxu0 %v411_v13  ;;  %1403 = vmatpush.msra.mxu1 %v411_v13 }
  0x62   : > { %433 = vmatpush.msra.mxu0 %v410_v14  ;;  %1404 = vmatpush.msra.mxu1 %v410_v14 }
  0x64   : > { %434 = vmatpush.msra.mxu0 %v409_v15  ;;  %1405 = vmatpush.msra.mxu1 %v409_v15 }
  0x66   : > { %435 = vmatpush.msra.mxu0 %v408_v16  ;;  %1406 = vmatpush.msra.mxu1 %v408_v16 }
  0x68   : > { %436 = vmatpush.msra.mxu0 %v407_v17  ;;  %1407 = vmatpush.msra.mxu1 %v407_v17 }
  0x6a   : > { %437 = vmatpush.msra.mxu0 %v406_v18  ;;  %1408 = vmatpush.msra.mxu1 %v406_v18 }
  0x6b   : > { %438 = vmatmul.f32.vlgmr.msra.gmra.mxu0 %v2012_v4  ;;  %441 = vmatmul.f32.vlgmr.msra.gmra.mxu1 %v2017_v5 }
  0xe8   : > { %v439_v19 = vpop.f32.mrf.mxu0  ;;  %v442_v20 = vpop.f32.mrf.mxu1 }
  0xe9   : > { %446 = vst.msk [vmem:[%s2269_s5] sm:$0xff] %vm445_vm0, %v439_v19  ;;  %v448_v21 = vsel %vm445_vm0, %v439_v19, -inf  ;;  %v451_v22 = vsel %vm445_vm0, %v442_v20, -inf }
  0xea   : > { %449 = vmax.xlane.f32.xlu0 %v448_v21  ;;  %447 = vst.msk [vmem:[%s2269_s5 + $0x8] sm:$0xff] %vm445_vm0, %v442_v20 }
  0xf2   : > { %452 = vmax.xlane.f32.xlu0 %v451_v22 }
 0x15d   : > { %v450_v23 = vpop.xlane.xlu0 %449 }
 0x15e   : > { %v454_v24 = vsub.f32 %v439_v19, %v450_v23 }
 0x160   : > { %v456_v25 = vmul.f32 1.442695, %v454_v24 }
 0x162   : > { %1503 = vpow2.f32 %v456_v25 }
 0x165   : > { %v453_v26 = vpop.xlane.xlu0 %452 }
 0x166   : > { %v455_v27 = vsub.f32 %v442_v20, %v453_v26 }
 0x168   : > { %v1504_v28 = vpop.eup %1503  ;;  %v458_v29 = vmul.f32 1.442695, %v455_v27 }
 0x169   : > { %v460_v30 = vsel %vm445_vm0, %v1504_v28, 0.0 }
 0x16a   : > { %1505 = vpow2.f32 %v458_v29  ;;  %461 = vadd.xlane.f32.xlu1 %v460_v30 }
 0x170   : > { %v1506_v31 = vpop.eup %1505 }
 0x171   : > { %v463_v32 = vsel %vm445_vm0, %v1506_v31, 0.0 }
 0x172   : > { %464 = vadd.xlane.f32.xlu1 %v463_v32 }
 0x1dd   : > { %v462_v33 = vpop.xlane.xlu1 %461 }
 0x1de   : > { %1507 = vrcp.f32 %v462_v33 }
 0x1e4   : > { %v1508_v34 = vpop.eup %1507 }
 0x1e5   : > { %v2071_v35 = vmul.f32 %v1508_v34, %v1504_v28  ;;  %v465_v36 = vpop.xlane.xlu1 %464 }
 0x1e6   : > { %1509 = vrcp.f32 %v465_v36 }
 0x1e7   : > { %v472_v37 = vsel %vm445_vm0, %v2071_v35, -inf }
 0x1e8   : > { %473 = vmax.xlane.f32.xlu2 %v472_v37  ;;  %v599_v37 = vmul.f32 %v2012_v4, %v2012_v4  ;;  %v600_v4 = vmul.f32 %v2017_v5, %v2017_v5 }
 0x1ec   : > { %v1510_v38 = vpop.eup %1509 }
 0x1ed   : > { %v2075_v39 = vmul.f32 %v1510_v38, %v1506_v31 }
 0x1ef   : > { %v475_v40 = vsel %vm445_vm0, %v2075_v39, -inf }
 0x1f0   : > { %476 = vmax.xlane.f32.xlu2 %v475_v40 }
 0x25b   : > { %v474_v43 = vpop.xlane.xlu2 %473 }
 0x25c   : > { %vm478_vm1 = vcmp.ge.f32.partialorder %v2071_v35, %v474_v43 }
 0x25d   : > { %v480_v44 = vsel %vm478_vm1, %v2079_v42, 8 }
 0x25e   : > { %v482_v45 = vsel %vm445_vm0, %v480_v44, 2147483647 }
 0x25f   : > { %v484_v46 = vshra.s32 %v482_v45, 16  ;;  %v483_v54 = vand.u32 65535, %v482_v45 }
 0x261   : > { %v486_v47 = vcvt.s32.f32 %v484_v46  ;;  %v485_v56 = vcvt.s32.f32 %v483_v54 }
 0x263   : > { %487 = vmin.xlane.f32.xlu0 %v486_v47  ;;  %v477_v48 = vpop.xlane.xlu2 %476 }
 0x264   : > { %vm479_vm2 = vcmp.ge.f32.partialorder %v2075_v39, %v477_v48 }
 0x265   : > { %v481_v49 = vsel %vm479_vm2, %v2079_v42, 8 }
 0x266   : > { %v497_v50 = vsel %vm445_vm0, %v481_v49, 2147483647 }
 0x267   : > { %v499_v51 = vshra.s32 %v497_v50, 16  ;;  %v498_v58 = vand.u32 65535, %v497_v50 }
 0x269   : > { %v501_v52 = vcvt.s32.f32 %v499_v51  ;;  %v500_v60 = vcvt.s32.f32 %v498_v58 }
 0x26b   : > { %502 = vmin.xlane.f32.xlu1 %v501_v52 }
 0x2d6   : > { %v488_v55 = vpop.xlane.xlu0 %487 }
 0x2d7   : > { %vm489_vm3 = vcmp.eq.f32.partialorder %v486_v47, %v488_v55  ;;  %v494_v62 = vcvt.f32.s32 %v488_v55 }
 0x2d8   : > { %v490_v57 = vsel %vm489_vm3, %v485_v56, inf }
 0x2d9   : > { %491 = vmin.xlane.f32.xlu2 %v490_v57  ;;  %v495_v0 = vshll.u32 %v494_v62, 16 }
 0x2de   : > { %v503_v59 = vpop.xlane.xlu1 %502 }
 0x2df   : > { %vm504_vm4 = vcmp.eq.f32.partialorder %v501_v52, %v503_v59  ;;  %v509_v3 = vcvt.f32.s32 %v503_v59 }
 0x2e0   : > { %v505_v61 = vsel %vm504_vm4, %v500_v60, inf }
 0x2e1   : > { %506 = vmin.xlane.f32.xlu0 %v505_v61  ;;  %v510_v9 = vshll.u32 %v509_v3, 16 }
 0x34c   : > { %v492_v63 = vpop.xlane.xlu2 %491 }
 0x34d   : > { %v493_v1 = vcvt.f32.s32 %v492_v63 }
 0x34f   : > { %v496_v2 = vadd.s32 %v495_v0, %v493_v1 }
 0x351   : > { %vm512_vm6 = vcmp.eq.s32.totalorder %v2079_v42, %v496_v2 }
 0x352   : > { %v2093_v6 = vsel %vm512_vm6, 1.0, %v1819_v53 }
 0x353   : > { %vm518_vm7 = vcmp.gt.f32.partialorder %v2093_v6, 0.5  ;;  %v587_v13 = vmul.f32 %v2093_v6, %v2071_v35  ;;  %v576_v15 = vsel %vm445_vm0, %v2093_v6, 0.0 }
 0x354   : > { %v507_v7 = vpop.xlane.xlu0 %506  ;;  %v520_v8 = vsel %vm518_vm7, -1e+30, %v2071_v35 }
 0x355   : > { %v508_v10 = vcvt.f32.s32 %v507_v7  ;;  %v522_v11 = vsel %vm445_vm0, %v520_v8, -inf  ;;  %v589_v20 = vsel %vm445_vm0, %v587_v13, 0.0 }
 0x356   : > { %523 = vmax.xlane.f32.xlu1 %v522_v11 }
 0x357   : > { %v511_v12 = vadd.s32 %v510_v9, %v508_v10 }
 0x359   : > { %vm513_vm8 = vcmp.eq.s32.totalorder %v2079_v42, %v511_v12 }
 0x35a   : > { %v2102_v14 = vsel %vm513_vm8, 1.0, %v1819_v53 }
 0x35b   : > { %v577_v16 = vsel %vm445_vm0, %v2102_v14, 0.0  ;;  %v588_v17 = vmul.f32 %v2102_v14, %v2075_v39  ;;  %vm519_vm9 = vcmp.gt.f32.partialorder %v2102_v14, 0.5 }
 0x35c   : > { %v578_v18 = vadd.f32 %v577_v16, %v576_v15  ;;  %v521_v19 = vsel %vm519_vm9, -1e+30, %v2075_v39 }
 0x35d   : > { %v590_v21 = vsel %vm445_vm0, %v588_v17, 0.0  ;;  %v525_v22 = vsel %vm445_vm0, %v521_v19, -inf }
 0x35e   : > { %v579_v23 = vrot.slane %v578_v18, 4  ;;  %v591_v24 = vadd.f32 %v590_v21, %v589_v20  ;;  %526 = vmax.xlane.f32.xlu2 %v525_v22 }
 0x360   : > { %v580_v25 = vadd.f32 %v579_v23, %v578_v18  ;;  %v592_v26 = vrot.slane %v591_v24, 4 }
 0x362   : > { %v581_v27 = vrot.slane %v580_v25, 2  ;;  %v593_v28 = vadd.f32 %v592_v26, %v591_v24 }
 0x364   : > { %v582_v29 = vadd.f32 %v581_v27, %v580_v25  ;;  %v594_v30 = vrot.slane %v593_v28, 2 }
 0x366   : > { %v583_v31 = vrot.slane %v582_v29, 1  ;;  %v595_v32 = vadd.f32 %v594_v30, %v593_v28  ;;  %601 = vadd.xlane.f32.xlu2 %v599_v37 }
 0x368   : > { %v584_v33 = vadd.f32 %v583_v31, %v582_v29  ;;  %v596_v34 = vrot.slane %v595_v32, 1 }
 0x36a   : > { %586 = vst.msk [vmem:[#allocation11] sm:$0x1] %vm585_vm5, %v584_v33  ;;  %v597_v36 = vadd.f32 %v596_v34, %v595_v32 }
 0x36c   : > { %598 = vst.msk [vmem:[#allocation13] sm:$0x1] %vm585_vm5, %v597_v36 }
 0x3c9   : > { %v524_v38 = vpop.xlane.xlu1 %523 }
 0x3ca   : > { %vm528_vm10 = vcmp.ge.f32.partialorder %v520_v8, %v524_v38 }
 0x3cb   : > { %v530_v40 = vsel %vm528_vm10, %v2079_v42, 8 }
 0x3cc   : > { %v532_v41 = vsel %vm445_vm0, %v530_v40, 2147483647 }
 0x3cd   : > { %v534_v43 = vshra.s32 %v532_v41, 16  ;;  %v533_v50 = vand.u32 65535, %v532_v41 }
 0x3cf   : > { %v536_v44 = vcvt.s32.f32 %v534_v43  ;;  %v535_v52 = vcvt.s32.f32 %v533_v50 }
 0x3d1   : > { %537 = vmin.xlane.f32.xlu0 %v536_v44  ;;  %v527_v45 = vpop.xlane.xlu2 %526 }
 0x3d2   : > { %vm529_vm11 = vcmp.ge.f32.partialorder %v521_v19, %v527_v45 }
 0x3d3   : > { %v531_v46 = vsel %vm529_vm11, %v2079_v42, 8 }
 0x3d4   : > { %v547_v47 = vsel %vm445_vm0, %v531_v46, 2147483647 }
 0x3d5   : > { %v549_v48 = vshra.s32 %v547_v47, 16  ;;  %v548_v55 = vand.u32 65535, %v547_v47 }
 0x3d7   : > { %v551_v49 = vcvt.s32.f32 %v549_v48  ;;  %v550_v57 = vcvt.s32.f32 %v548_v55 }
 0x3d9   : > { %552 = vmin.xlane.f32.xlu1 %v551_v49  ;;  %603 = vadd.xlane.f32.xlu0 %v600_v4  ;;  %v602_v59 = vpop.xlane.xlu2 %601 }
 0x3da   : > { %1511 = vrsqrt.f32 %v602_v59  ;;  %vm612_vm15 = vcmp.eq.f32.partialorder %v602_v59, inf  ;;  %v615_v26 = vand.u32 2147483648, %v602_v59  ;;  %vm614_vm2 = vcmp.eq.f32.partialorder %v602_v59, 0.0 }
 0x3e0   : > { %v1512_v5 = vpop.eup %1511 }
 0x3e1   : > { %v606_v62 = vmul.f32 %v1512_v5, %v602_v59 }
 0x3e3   : > { %v607_v0 = vmul.f32 %v1512_v5, %v606_v62 }
 0x3e5   : > { %v608_v2 = vmul.f32 0.5, %v607_v0 }
 0x3e7   : > { %v609_v8 = vsub.f32 1.5, %v608_v2 }
 0x3e9   : > { %v610_v13 = vmul.f32 %v1512_v5, %v609_v8 }
 0x3eb   : > { %v611_v19 = vmul.f32 %v610_v13, %v602_v59 }
 0x3ed   : > { %v613_v27 = vsel %vm612_vm15, %v602_v59, %v611_v19 }
 0x444   : > { %v538_v51 = vpop.xlane.xlu0 %537 }
 0x445   : > { %vm539_vm12 = vcmp.eq.f32.partialorder %v536_v44, %v538_v51  ;;  %v544_v3 = vcvt.f32.s32 %v538_v51 }
 0x446   : > { %v540_v54 = vsel %vm539_vm12, %v535_v52, inf }
 0x447   : > { %541 = vmin.xlane.f32.xlu1 %v540_v54  ;;  %v545_v10 = vshll.u32 %v544_v3, 16 }
 0x44c   : > { %v553_v56 = vpop.xlane.xlu1 %552  ;;  %v604_v60 = vpop.xlane.xlu0 %603 }
 0x44d   : > { %vm554_vm13 = vcmp.eq.f32.partialorder %v551_v49, %v553_v56  ;;  %1513 = vrsqrt.f32 %v604_v60  ;;  %v559_v16 = vcvt.f32.s32 %v553_v56  ;;  %vm624_vm1 = vcmp.eq.f32.partialorder %v604_v60, inf }
 0x44e   : > { %v555_v58 = vsel %vm554_vm13, %v550_v57, inf  ;;  %v627_v29 = vand.u32 2147483648, %v604_v60  ;;  %vm626_vm3 = vcmp.eq.f32.partialorder %v604_v60, 0.0 }
 0x44f   : > { %556 = vmin.xlane.f32.xlu2 %v555_v58  ;;  %v560_v22 = vshll.u32 %v559_v16, 16 }
 0x453   : > { %v1514_v61 = vpop.eup %1513 }
 0x454   : > { %v618_v63 = vmul.f32 %v1514_v61, %v604_v60 }
 0x456   : > { %v619_v1 = vmul.f32 %v1514_v61, %v618_v63 }
 0x458   : > { %v620_v7 = vmul.f32 0.5, %v619_v1 }
 0x45a   : > { %v621_v11 = vsub.f32 1.5, %v620_v7 }
 0x45c   : > { %v622_v17 = vmul.f32 %v1514_v61, %v621_v11 }
 0x45e   : > { %v623_v23 = vmul.f32 %v622_v17, %v604_v60 }
 0x460   : > { %v625_v30 = vsel %vm624_vm1, %v604_v60, %v623_v23 }
 0x4ba   : > { %v542_v9 = vpop.xlane.xlu1 %541 }
 0x4bb   : > { %v543_v12 = vcvt.f32.s32 %v542_v9 }
 0x4bd   : > { %v546_v15 = vadd.s32 %v545_v10, %v543_v12 }
 0x4bf   : > { %vm562_vm14 = vcmp.eq.s32.totalorder %v2079_v42, %v546_v15 }
 0x4c0   : > { %v1241_v18 = vsel %vm562_vm14, 1.0, %v1819_v53 }
 0x4c1   : > { %v568_v20 = vadd.f32 %v1241_v18, %v2093_v6  ;;  %v616_v6 = vsel %vm614_vm2, %v615_v26, %v613_v27 }
 0x4c2   : > { %v557_v21 = vpop.xlane.xlu2 %556 }
 0x4c3   : > { %570 = vst.msk [vmem:[#allocation4] sm:$0xff] %vm445_vm0, %v568_v20  ;;  %v572_v24 = vmul.f32 %v568_v20, %v2071_v35  ;;  %v558_v25 = vcvt.f32.s32 %v557_v21  ;;  %v638_v32 = vmul.f32 %v616_v6, %v568_v20  ;;  %v628_v35 = vsel %vm626_vm3, %v627_v29, %v625_v30 }
 0x4c4   : > { %v629_v34 = vsel %vm445_vm0, %v568_v20, 0.0 }
 0x4c5   : > { %574 = vst.msk [vmem:[#allocation3] sm:$0xff] %vm445_vm0, %v572_v24  ;;  %v561_v28 = vadd.s32 %v560_v22, %v558_v25  ;;  %v640_v41 = vsel %vm445_vm0, %v638_v32, 0.0 }
 0x4c7   : > { %vm563_vm4 = vcmp.eq.s32.totalorder %v2079_v42, %v561_v28 }
 0x4c8   : > { %v1242_v31 = vsel %vm563_vm4, 1.0, %v1819_v53 }
 0x4c9   : > { %v569_v33 = vadd.f32 %v1242_v31, %v2102_v14 }
 0x4cb   : > { %571 = vst.msk [vmem:[#allocation4 + $0x8] sm:$0xff] %vm445_vm0, %v569_v33  ;;  %v573_v36 = vmul.f32 %v569_v33, %v2075_v39  ;;  %v630_v37 = vsel %vm445_vm0, %v569_v33, 0.0  ;;  %v639_v38 = vmul.f32 %v628_v35, %v569_v33 }
 0x4cc   : > { %v631_v40 = vadd.f32 %v630_v37, %v629_v34 }
 0x4cd   : > { %575 = vst.msk [vmem:[#allocation3 + $0x8] sm:$0xff] %vm445_vm0, %v573_v36  ;;  %v641_v42 = vsel %vm445_vm0, %v639_v38, 0.0 }
 0x4ce   : > { %v632_v43 = vrot.slane %v631_v40, 4  ;;  %v642_v44 = vadd.f32 %v641_v42, %v640_v41 }
 0x4d0   : > { %v633_v14 = vadd.f32 %v632_v43, %v631_v40  ;;  %v643_v45 = vrot.slane %v642_v44, 4 }
 0x4d2   : > { %v634_v46 = vrot.slane %v633_v14, 2  ;;  %v644_v47 = vadd.f32 %v643_v45, %v642_v44 }
 0x4d4   : > { %v635_v48 = vadd.f32 %v634_v46, %v633_v14  ;;  %v645_v4 = vrot.slane %v644_v47, 2 }
 0x4d6   : > { %v636_v49 = vrot.slane %v635_v48, 1  ;;  %v646_v50 = vadd.f32 %v645_v4, %v644_v47 }
 0x4d8   : > { %v637_v39 = vadd.f32 %v636_v49, %v635_v48  ;;  %v647_v54 = vrot.slane %v646_v50, 1 }
 0x4da   : > { %v649_v51 = vmax.f32 %v637_v39, 1.0  ;;  %vm650_vm6 = vcmp.gt.f32.partialorder %v637_v39, 0.0  ;;  %v648_v55 = vadd.f32 %v647_v54, %v646_v50 }
 0x4db   : > { %v1243_v52 = vsel %vm650_vm6, 1.0, %v1819_v53 }
 0x4dc   : > { %1515 = vrcp.f32 %v649_v51  ;;  %657 = vst.msk [vmem:[#allocation16] sm:$0x1] %vm585_vm5, %v1243_v52 }
 0x4e2   : > { %v1516_v56 = vpop.eup %1515 }
 0x4e3   : > { %v652_v57 = vmul.f32 %v1516_v56, %v648_v55 }
 0x4e5   : > { %v653_v58 = vsel %vm650_vm6, %v652_v57, 0.0 }
 0x4e6   : > { %654 = vst.msk [vmem:[#allocation14] sm:$0x1] %vm585_vm5, %v653_v58 }
 0x4e7 PF: > { %v1306_v53 = vld [vmem:[%s1984_s28 + $0x70] sm:$0xf]  ;;  %v1379_v59 = vld [vmem:[%s1984_s28 + $0x74] sm:$0xf0]  ;;  %v1298_v60 = vld [vmem:[%s1984_s28 + $0x60] sm:$0xf]  ;;  %v914_v58 = vlaneseq }
 0x4e8   : > { %v1307_v5 = vor.u32 %v1379_v59, %v1306_v53  ;;  %v1377_v61 = vld [vmem:[%s1984_s28 + $0x64] sm:$0xf0]  ;;  %v1290_v63 = vld [vmem:[%s1984_s28 + $0x50] sm:$0xf]  ;;  %v1375_v0 = vld [vmem:[%s1984_s28 + $0x54] sm:$0xf0]  ;;  %v916_v53 = vstv %s1903_s17 }
 0x4e9   : > { %v1299_v62 = vor.u32 %v1377_v61, %v1298_v60  ;;  %v1378_v1 = vld [vmem:[%s1984_s28 + $0x74] sm:$0xf]  ;;  %v1308_v2 = vld [vmem:[%s1984_s28 + $0x78] sm:$0xf0]  ;;  %v1376_v7 = vld [vmem:[%s1984_s28 + $0x64] sm:$0xf]  ;;  %v1291_v9 = vor.u32 %v1375_v0, %v1290_v63 }
 0x4ea   : > { %765 = vmatpush.bf16.msra.mxu0 %v1307_v5  ;;  %v1311_v3 = vor.u32 %v1378_v1, %v1308_v2  ;;  %v1300_v8 = vld [vmem:[%s1984_s28 + $0x68] sm:$0xf0]  ;;  %v1282_v10 = vld [vmem:[%s1984_s28 + $0x40] sm:$0xf]  ;;  %v1373_v12 = vld [vmem:[%s1984_s28 + $0x44] sm:$0xf0] }
 0x4eb   : > { %v1303_v11 = vor.u32 %v1376_v7, %v1300_v8  ;;  %v1374_v13 = vld [vmem:[%s1984_s28 + $0x54] sm:$0xf]  ;;  %v1292_v15 = vld [vmem:[%s1984_s28 + $0x58] sm:$0xf0]  ;;  %v1283_v16 = vor.u32 %v1373_v12, %v1282_v10  ;;  %v1274_v17 = vld [vmem:[%s1984_s28 + $0x30] sm:$0xf] }
 0x4ec   : > { %779 = vmatpush.bf16.msra.mxu1 %v1311_v3  ;;  %v1295_v18 = vor.u32 %v1374_v13, %v1292_v15  ;;  %v1371_v19 = vld [vmem:[%s1984_s28 + $0x34] sm:$0xf0]  ;;  %v1372_v20 = vld [vmem:[%s1984_s28 + $0x44] sm:$0xf]  ;;  %v1284_v21 = vld [vmem:[%s1984_s28 + $0x48] sm:$0xf0] }
 0x4ed   : > { %v1275_v22 = vor.u32 %v1371_v19, %v1274_v17  ;;  %v1266_v23 = vld [vmem:[%s1984_s28 + $0x20] sm:$0xf]  ;;  %v1287_v24 = vor.u32 %v1372_v20, %v1284_v21  ;;  %v1369_v25 = vld [vmem:[%s1984_s28 + $0x24] sm:$0xf0]  ;;  %v1370_v26 = vld [vmem:[%s1984_s28 + $0x34] sm:$0xf] }
 0x4ee   : > { %766 = vmatpush.bf16.msra.mxu0 %v1299_v62  ;;  %v1276_v27 = vld [vmem:[%s1984_s28 + $0x38] sm:$0xf0]  ;;  %v1267_v28 = vor.u32 %v1369_v25, %v1266_v23  ;;  %v1258_v29 = vld [vmem:[%s1984_s28 + $0x10] sm:$0xf]  ;;  %v1367_v6 = vld [vmem:[%s1984_s28 + $0x14] sm:$0xf0] }
 0x4ef   : > { %v1279_v30 = vor.u32 %v1370_v26, %v1276_v27  ;;  %v1368_v31 = vld [vmem:[%s1984_s28 + $0x24] sm:$0xf]  ;;  %v1268_v32 = vld [vmem:[%s1984_s28 + $0x28] sm:$0xf0]  ;;  %v1259_v33 = vor.u32 %v1367_v6, %v1258_v29  ;;  %v1250_v35 = vld [vmem:[%s1984_s28] sm:$0xf] }
 0x4f0   : > { %780 = vmatpush.bf16.msra.mxu1 %v1303_v11  ;;  %v1271_v34 = vor.u32 %v1368_v31, %v1268_v32  ;;  %v1365_v36 = vld [vmem:[%s1984_s28 + $0x4] sm:$0xf0]  ;;  %v1366_v37 = vld [vmem:[%s1984_s28 + $0x14] sm:$0xf]  ;;  %v1260_v38 = vld [vmem:[%s1984_s28 + $0x18] sm:$0xf0] }
 0x4f1   : > { %v1251_v40 = vor.u32 %v1365_v36, %v1250_v35  ;;  %v1263_v41 = vor.u32 %v1366_v37, %v1260_v38  ;;  %v1364_v42 = vld [vmem:[%s1984_s28 + $0x4] sm:$0xf]  ;;  %v1252_v43 = vld [vmem:[%s1984_s28 + $0x8] sm:$0xf0]  ;;  %v1363_v44 = vld [vmem:[#allocation2] sm:$0xff]  ;;  %v915_v59 = vand.u32 127, %v914_v58 }
 0x4f2   : > { %767 = vmatpush.bf16.msra.mxu0 %v1291_v9  ;;  %v1255_v14 = vor.u32 %v1364_v42, %v1252_v43  ;;  %v1387_v45 = vld [vmem:[%s1990_s13 + $0x38] sm:$0xff]  ;;  %v1386_v46 = vld [vmem:[%s1990_s13 + $0x30] sm:$0xff]  ;;  %v1385_v47 = vld [vmem:[%s1990_s13 + $0x28] sm:$0xff]  ;;  %v1820_v61 = vmov 0.0   ;;  %vm924_vm5 = vcmask 64512   ;;  %p1445_p7 = scmp.eq.s32.totalorder %s1903_s17, 7 }
 0x4f3   : > { %900 = vmatpush.bf16.msra.mxu2 %v1387_v45  ;;  %v1384_v48 = vld [vmem:[%s1990_s13 + $0x20] sm:$0xff]  ;;  %v1383_v4 = vld [vmem:[%s1990_s13 + $0x18] sm:$0xff]  ;;  %v1382_v49 = vld [vmem:[%s1990_s13 + $0x10] sm:$0xff]  ;;  %vm917_vm0 = vcmp.eq.s32.totalorder %v915_v59, %v916_v53  ;;  %s1821_s28 = smov [#allocation11]   ;;  %s1043_s30 = sshll.u32 %s2270_s6, 4  ;;  %s1044_s30 = int_to_ptr.hbm [resolvable:$true] %s1043_s30 }
 0x4f4   : > { %781 = vmatpush.bf16.msra.mxu1 %v1295_v18  ;;  %v1381_v51 = vld [vmem:[%s1990_s13 + $0x8] sm:$0xff]  ;;  %v1380_v52 = vld [vmem:[%s1990_s13] sm:$0xff]  ;;  %v931_v5 = vld [vmem:[#allocation4] sm:$0xff]  ;;  %v2191_v62 = vsel %vm917_vm0, 1.0, %v1820_v61  ;;  %s1041_s13 = sshll.u32 %s1821_s28, 4  ;;  %s1067_s25 = sshll.u32 %s2272_s8, 4  ;;  %s1042_s13 = int_to_ptr.vmem [resolvable:$true] %s1041_s13  ;;  %s1068_s25 = int_to_ptr.hbm [resolvable:$true] %s1067_s25 }
 0x4f5   : > { %v920_v60 = vld [vmem:[#allocation3] sm:$0xff]  ;;  %v933_v1 = vmul.f32 %v2191_v62, %v931_v5  ;;  %v921_v7 = vld [vmem:[#allocation3 + $0x8] sm:$0xff]  ;;  %v932_v10 = vld [vmem:[#allocation4 + $0x8] sm:$0xff]  ;;  %1416 = dma.vmem_to_hbm [thread:$0]  (%p1445_p7), %s1042_s13, 16, %s1044_s30, [#allocation12]  }
 0x4f6   : > { %768 = vmatpush.bf16.msra.mxu0 %v1283_v16  ;;  %v922_v0 = vmul.f32 %v2191_v62, %v920_v60  ;;  %v923_v12 = vmul.f32 %v2191_v62, %v921_v7  ;;  %v934_v16 = vmul.f32 %v2191_v62, %v932_v10  ;;  %s1822_s20 = smov [#allocation14]   ;;  %s1823_s27 = smov [#allocation10]  }
 0x4f7   : > { %901 = vmatpush.bf16.msra.mxu2 %v1386_v46  ;;  %v935_v13 = vsel %vm924_vm5, %v933_v1, 0.0  ;;  %s1065_s26 = sshll.u32 %s1822_s20, 4  ;;  %s1023_s11 = sshll.u32 %s1823_s27, 4  ;;  %s1066_s26 = int_to_ptr.vmem [resolvable:$true] %s1065_s26  ;;  %s1024_s11 = int_to_ptr.vmem [resolvable:$true] %s1023_s11 }
 0x4f8   : > { %782 = vmatpush.bf16.msra.mxu1 %v1287_v24  ;;  %v925_v9 = vsel %vm924_vm5, %v922_v0, 0.0  ;;  %936 = vadd.xlane.f32.xlu1 %v935_v13  ;;  %v928_v18 = vsel %vm924_vm5, %v923_v12, 0.0  ;;  %v938_v23 = vsel %vm924_vm5, %v934_v16, 0.0  ;;  %1420 = dma.vmem_to_hbm [thread:$0]  (%p1445_p7), %s1066_s26, 16, %s1068_s25, [#allocation15]  }
 0x4f9   : > { %926 = vadd.xlane.f32.xlu2 %v925_v9  ;;  %s1025_s15 = sshll.u32 %s2268_s4, 4  ;;  %s1824_s18 = smov 128   ;;  %s1026_s15 = int_to_ptr.hbm [resolvable:$true] %s1025_s15 }
 0x4fa   : > { %769 = vmatpush.bf16.msra.mxu0 %v1275_v22  ;;  %s1825_s21 = smov 8   ;;  %s1055_s28 = sshll.u32 %s2271_s7, 4  ;;  %s1056_s28 = int_to_ptr.hbm [resolvable:$true] %s1055_s28 }
 0x4fb   : > { %902 = vmatpush.bf16.msra.mxu2 %v1385_v47  ;;  %s1826_s13 = smov [#allocation13]   ;;  %s1827_s29 = smov [#allocation16]  }
 0x4fc   : > { %783 = vmatpush.bf16.msra.mxu1 %v1279_v30  ;;  %s1053_s23 = sshll.u32 %s1826_s13, 4  ;;  %s1077_s30 = sshll.u32 %s1827_s29, 4  ;;  %s1054_s23 = int_to_ptr.vmem [resolvable:$true] %s1053_s23  ;;  %s1078_s30 = int_to_ptr.vmem [resolvable:$true] %s1077_s30 }
 0x4fd   : > { %1418 = dma.vmem_to_hbm [thread:$0]  (%p1445_p7), %s1054_s23, 16, %s1056_s28, [#allocation12]  }
 0x4fe   : > { %770 = vmatpush.bf16.msra.mxu0 %v1267_v28  ;;  %s1079_s25 = sshll.u32 %s2273_s9, 4  ;;  %s1828_s20 = smov [#allocation17]   ;;  %s1080_s25 = int_to_ptr.hbm [resolvable:$true] %s1079_s25 }
 0x4ff   : > { %903 = vmatpush.bf16.msra.mxu2 %v1384_v48  ;;  %1422 = dma.vmem_to_hbm [thread:$0]  (%p1445_p7), %s1078_s30, 16, %s1080_s25, [#allocation15]  }
 0x500   : > { %784 = vmatpush.bf16.msra.mxu1 %v1271_v34  ;;  %939 = vadd.xlane.f32.xlu1 %v938_v23  ;;  %s1089_s26 = sshll.u32 %s1828_s20, 4  ;;  %s1091_s12 = sshll.u32 %s2274_s10, 4  ;;  %s1090_s26 = int_to_ptr.vmem [resolvable:$true] %s1089_s26  ;;  %s1092_s12 = int_to_ptr.hbm [resolvable:$true] %s1091_s12 }
 0x501   : > { %929 = vadd.xlane.f32.xlu2 %v928_v18 }
 0x502   : > { %771 = vmatpush.bf16.msra.mxu0 %v1259_v33 }
 0x503   : > { %904 = vmatpush.bf16.msra.mxu2 %v1383_v4  ;;  %v942_v4 = vld [vmem:[#allocation10 + $0x8] sm:$0xff] }
 0x504   : > { %785 = vmatpush.bf16.msra.mxu1 %v1263_v41 }
 0x506   : > { %772 = vmatpush.bf16.msra.mxu0 %v1251_v40 }
 0x507   : > { %905 = vmatpush.bf16.msra.mxu2 %v1382_v49 }
 0x508   : > { %786 = vmatpush.bf16.msra.mxu1 %v1255_v14 }
 0x509   : > { %773 = vmatmul.bf16.vlgmr.msra.gmra.mxu0 %v1363_v44 }
 0x50b   : > { %787 = vmatmul.bf16.vlgmr.msra.gmra.mxu1 %v1363_v44  ;;  %906 = vmatpush.bf16.msra.mxu2 %v1381_v51  ;;  %v941_v44 = vld [vmem:[#allocation10] sm:$0xff] }
 0x50f   : > { %907 = vmatpush.bf16.msra.mxu2 %v1380_v52 }
 0x56b   : > { %v937_v51 = vpop.xlane.xlu1 %936 }
 0x56c   : > { %v927_v42 = vpop.xlane.xlu2 %926 }
 0x573   : > { %v940_v52 = vpop.xlane.xlu1 %939 }
 0x574   : > { %v930_v47 = vpop.xlane.xlu2 %929 }
 0x586   : > { %v2182_v39 = vpop.f32.mrf.mxu0 }
 0x587   : > { %v1312_v50 = vmul.f32 -1.442695, %v2182_v39 }
 0x588   : > { %v788_v24 = vpop.f32.mrf.mxu1 }
 0x589   : > { %1517 = vpow2.f32 %v1312_v50 }
 0x58e   : > { %v2187_v54 = vpop.f32.mrf.mxu0 }
 0x58f   : > { %v1518_v55 = vpop.eup %1517  ;;  %v1313_v56 = vmul.f32 -1.442695, %v2187_v54 }
 0x590   : > { %v799_v57 = vadd.f32 1.0, %v1518_v55  ;;  %v790_v37 = vpop.f32.mrf.mxu1 }
 0x591   : > { %1519 = vpow2.f32 %v1313_v56 }
 0x592   : > { %1521 = vrcp.f32 %v799_v57  ;;  %v812_v20 = vand.u32 2147483648, %v799_v57  ;;  %vm806_vm8 = vweird.f32 %v799_v57  ;;  %v810_v21 = vand.u32 2147483647, %v799_v57 }
 0x594   : > { %v813_v27 = vor.u32 1.1754944e-38, %v812_v20  ;;  %vm811_vm10 = vcmp.eq.f32.partialorder %v810_v21, 8.507059e+37 }
 0x597   : > { %v1520_v63 = vpop.eup %1519 }
 0x598   : > { %v1522_v2 = vpop.eup %1521  ;;  %v800_v3 = vadd.f32 1.0, %v1520_v63 }
 0x599   : > { %v802_v8 = vmul.f32 %v1522_v2, %v799_v57  ;;  %vm807_vm7 = vweird.f32 %v1522_v2 }
 0x59a   : > { %1523 = vrcp.f32 %v800_v3  ;;  %vm808_vm9 = vmor %vm806_vm8, %vm807_vm7  ;;  %v827_v28 = vand.u32 2147483648, %v800_v3  ;;  %v825_v30 = vand.u32 2147483647, %v800_v3  ;;  %vm821_vm12 = vweird.f32 %v800_v3 }
 0x59b   : > { %v803_v11 = vsub.f32 1.0, %v802_v8  ;;  %vm1016_vm8 = vcmask 57344  }
 0x59c   : > { %v828_v32 = vor.u32 1.1754944e-38, %v827_v28  ;;  %vm826_vm14 = vcmp.eq.f32.partialorder %v825_v30, 8.507059e+37 }
 0x59d   : > { %v804_v15 = vmul.f32 %v1522_v2, %v803_v11 }
 0x59f   : > { %v805_v17 = vadd.f32 %v1522_v2, %v804_v15 }
 0x5a0   : > { %v1524_v19 = vpop.eup %1523 }
 0x5a1   : > { %v817_v22 = vmul.f32 %v1524_v19, %v800_v3  ;;  %v809_v25 = vsel %vm808_vm9, %v1522_v2, %v805_v17  ;;  %vm822_vm11 = vweird.f32 %v1524_v19 }
 0x5a2   : > { %v814_v6 = vsel %vm811_vm10, %v813_v27, %v809_v25  ;;  %vm823_vm13 = vmor %vm821_vm12, %vm822_vm11 }
 0x5a3   : > { %v818_v26 = vsub.f32 1.0, %v817_v22  ;;  %v831_v33 = vmul.f32 %v814_v6, %v2182_v39 }
 0x5a5   : > { %v819_v29 = vmul.f32 %v1524_v19, %v818_v26  ;;  %v833_v38 = vmul.f32 %v831_v33, %v788_v24 }
 0x5a7   : > { %v820_v31 = vadd.f32 %v1524_v19, %v819_v29 }
 0x5a9   : > { %v824_v35 = vsel %vm823_vm13, %v1524_v19, %v820_v31 }
 0x5aa   : > { %v829_v34 = vsel %vm826_vm14, %v828_v32, %v824_v35 }
 0x5ab   : > { %v832_v36 = vmul.f32 %v829_v34, %v2187_v54  ;;  %v979_v54 = vadd.f32 %v940_v52, %v937_v51 }
 0x5ad   : > { %v834_v40 = vmul.f32 %v832_v36, %v790_v37  ;;  %v980_v55 = vrot.slane %v979_v54, 4 }
 0x5af   : > { %v835_v41 = vpack.c.bf16 %v834_v40, %v833_v38  ;;  %v981_v56 = vadd.f32 %v980_v55, %v979_v54 }
 0x5b1   : > { %908 = vmatmul.bf16.vlgmr.msra.gmra.mxu2 %v835_v41  ;;  %v982_v57 = vrot.slane %v981_v56, 2 }
 0x5b3   : > { %v983_v53 = vadd.f32 %v982_v57, %v981_v56 }
 0x5b5   : > { %v984_v59 = vrot.slane %v983_v53, 1 }
 0x5b7   : > { %v985_v63 = vadd.f32 %v984_v59, %v983_v53 }
 0x5b9   : > { %v995_v2 = vmax.f32 %v985_v63, 1.0  ;;  %vm996_vm7 = vcmp.gt.f32.partialorder %v985_v63, 0.0 }
 0x5bb   : > { %vm1002_vm4 = vweird.f32 %v995_v2  ;;  %v1008_v31 = vand.u32 2147483648, %v995_v2  ;;  %v1006_v35 = vand.u32 2147483647, %v995_v2 }
 0x5bd   : > { %v1009_v36 = vor.u32 1.1754944e-38, %v1008_v31  ;;  %vm1007_vm5 = vcmp.eq.f32.partialorder %v1006_v35, 8.507059e+37 }
 0x634   : > { %v909_v43 = vpop.f32.mrf.mxu2 }
 0x635   : > { %v943_v14 = vmul.f32 %v927_v42, %v909_v43  ;;  %v949_v45 = vmul.f32 %v909_v43, %v909_v43 }
 0x637   : > { %v945_v46 = vadd.f32 %v943_v14, %v941_v44  ;;  %951 = vadd.xlane.f32.xlu0 %v949_v45  ;;  %v1013_v44 = vld [vmem:[#allocation17] sm:$0x1] }
 0x639   : > { %947 = vst [vmem:[#allocation10] sm:$0xff] %v945_v46 }
 0x63c   : > { %v911_v48 = vpop.f32.mrf.mxu2 }
 0x63d   : > { %v944_v49 = vmul.f32 %v930_v47, %v911_v48  ;;  %v950_v39 = vmul.f32 %v911_v48, %v911_v48 }
 0x63f   : > { %v946_v50 = vadd.f32 %v944_v49, %v942_v4  ;;  %953 = vadd.xlane.f32.xlu0 %v950_v39 }
 0x641   : > { %948 = vst [vmem:[#allocation10 + $0x8] sm:$0xff] %v946_v50 }
 0x642   : > { %1414 = dma.vmem_to_hbm [thread:$0]  (%p1445_p7), %s1024_s11, 256, %s1026_s15, [#allocation7], %s1824_s18, %s1824_s18, %s1825_s21  }
 0x6aa   : > { %v952_v58 = vpop.xlane.xlu0 %951 }
 0x6ab   : > { %1525 = vrsqrt.f32 %v952_v58  ;;  %vm962_vm15 = vcmp.eq.f32.partialorder %v952_v58, inf  ;;  %v965_v18 = vand.u32 2147483648, %v952_v58  ;;  %vm964_vm1 = vcmp.eq.f32.partialorder %v952_v58, 0.0 }
 0x6b1   : > { %v1526_v60 = vpop.eup %1525 }
 0x6b2   : > { %v956_v5 = vmul.f32 %v1526_v60, %v952_v58  ;;  %v954_v61 = vpop.xlane.xlu0 %953 }
 0x6b3   : > { %1527 = vrsqrt.f32 %v954_v61  ;;  %vm974_vm2 = vcmp.eq.f32.partialorder %v954_v61, inf  ;;  %v977_v22 = vand.u32 2147483648, %v954_v61  ;;  %vm976_vm3 = vcmp.eq.f32.partialorder %v954_v61, 0.0 }
 0x6b4   : > { %v957_v0 = vmul.f32 %v1526_v60, %v956_v5  ;;  %1529 = vrcp.f32 %v995_v2 }
 0x6b6   : > { %v958_v1 = vmul.f32 0.5, %v957_v0 }
 0x6b8   : > { %v959_v3 = vsub.f32 1.5, %v958_v1 }
 0x6b9   : > { %v1528_v7 = vpop.eup %1527 }
 0x6ba   : > { %v960_v8 = vmul.f32 %v1526_v60, %v959_v3  ;;  %v968_v9 = vmul.f32 %v1528_v7, %v954_v61  ;;  %v1530_v15 = vpop.eup %1529 }
 0x6bb   : > { %v998_v19 = vmul.f32 %v1530_v15, %v995_v2  ;;  %vm1003_vm6 = vweird.f32 %v1530_v15 }
 0x6bc   : > { %v969_v10 = vmul.f32 %v1528_v7, %v968_v9  ;;  %v961_v11 = vmul.f32 %v960_v8, %v952_v58  ;;  %vm1004_vm0 = vmor %vm1002_vm4, %vm1003_vm6 }
 0x6bd   : > { %v999_v25 = vsub.f32 1.0, %v998_v19 }
 0x6be   : > { %v970_v12 = vmul.f32 0.5, %v969_v10  ;;  %v963_v16 = vsel %vm962_vm15, %v952_v58, %v961_v11 }
 0x6bf   : > { %v966_v21 = vsel %vm964_vm1, %v965_v18, %v963_v16  ;;  %v1000_v30 = vmul.f32 %v1530_v15, %v999_v25 }
 0x6c0   : > { %v971_v13 = vsub.f32 1.5, %v970_v12  ;;  %v986_v26 = vmul.f32 %v966_v21, %v937_v51 }
 0x6c1   : > { %v1001_v33 = vadd.f32 %v1530_v15, %v1000_v30 }
 0x6c2   : > { %v972_v17 = vmul.f32 %v1528_v7, %v971_v13 }
 0x6c3   : > { %v1005_v38 = vsel %vm1004_vm0, %v1530_v15, %v1001_v33 }
 0x6c4   : > { %v973_v20 = vmul.f32 %v972_v17, %v954_v61  ;;  %v1010_v41 = vsel %vm1007_vm5, %v1009_v36, %v1005_v38 }
 0x6c6   : > { %v975_v23 = vsel %vm974_vm2, %v954_v61, %v973_v20 }
 0x6c7   : > { %v978_v24 = vsel %vm976_vm3, %v977_v22, %v975_v23 }
 0x6c8   : > { %v987_v27 = vmul.f32 %v978_v24, %v940_v52 }
 0x6ca   : > { %v988_v28 = vadd.f32 %v987_v27, %v986_v26 }
 0x6cc   : > { %v989_v29 = vrot.slane %v988_v28, 4 }
 0x6ce   : > { %v990_v6 = vadd.f32 %v989_v29, %v988_v28 }
 0x6d0   : > { %v991_v32 = vrot.slane %v990_v6, 2 }
 0x6d2   : > { %v992_v34 = vadd.f32 %v991_v32, %v990_v6 }
 0x6d4   : > { %v993_v37 = vrot.slane %v992_v34, 1 }
 0x6d6   : > { %v994_v40 = vadd.f32 %v993_v37, %v992_v34 }
 0x6d8   : > { %v1011_v42 = vmul.f32 %v1010_v41, %v994_v40 }
 0x6da   : > { %v1012_v43 = vsel %vm996_vm7, %v1011_v42, 0.0 }
 0x6db   : > { %v1014_v14 = vmul.f32 %v2191_v62, %v1012_v43 }
 0x6dd   : > { %v1015_v45 = vadd.f32 %v1014_v14, %v1013_v44 }
 0x6df   : > { %1017 = vst.msk [vmem:[#allocation17] sm:$0x1] %vm1016_vm8, %v1015_v45 }
 0x6e0   : > { %1424 = dma.vmem_to_hbm [thread:$0]  (%p1445_p7), %s1090_s26, 16, %s1092_s12, [#allocation18]  }
 0x6e1   : > { %1784 = dma.done.wait (%p1445_p7), [#allocation7], 256  }
 0x6e2   : > { %1786 = vsyncadd (%p1445_p7), [#allocation7], 4294967040 }
 0x6e3   : > { %1788 = dma.done.wait (%p1445_p7), [#allocation12], 32  }
 0x6e4   : > { %1790 = vsyncadd (%p1445_p7), [#allocation12], 4294967264 }
 0x6e5   : > { %1792 = dma.done.wait (%p1445_p7), [#allocation15], 32  }
 0x6e6   : > { %1794 = vsyncadd (%p1445_p7), [#allocation15], 4294967264 }
 0x6e7   : > { %1796 = dma.done.wait (%p1445_p7), [#allocation18], 16  }
 0x6e8   : > { %1798 = vsyncadd (%p1445_p7), [#allocation18], 4294967280 }
 0x6e9 PF: > { %s2287_s16 = sld [smem:[#allocation26_spill]]  ;;  %s2290_s13 = smov %s1805_s14 }
 0x6ea   : > { %s2288_s2 = sld [smem:[#allocation25_spill]] }
 0x6eb   : > { %s2289_s15 = sld [smem:[#allocation27_spill]] }
 0x6ef   : > { %p28_p11 = scmp.ge.s32.totalorder %s2287_s16, 10  }
 0x6f0   : > { %s2291_s14 = smov %s2288_s2 }
 0x6f1   :  { %30 = sbr.rel (!%p28_p11) target bundleno = 11 (0xb), region = 138 }
 0x6f6   :  { %1133 = vsyncpa [#allocation6], 1 }
 0x6f7   :  { %1135 = vsyncpa [#allocation6 + $0x1], 1 }
 0x6f8   :  { %1136 = vsyncpa [#allocation9], 1 }
 0x6f9   :  { %1138 = vsyncpa [#allocation9 + $0x1], 1 }
 0x6fa   :  { %1139 = vsyncpa [#allocation7], 1 }
 0x6fb   :  { %1141 = vsyncpa [#allocation7 + $0x1], 1 }
 0x6fc   :  { %1142 = vsyncpa [#allocation12], 1 }
 0x6fd   :  { %1143 = vsyncpa [#allocation15], 1 }
 0x6fe   :  { %1144 = vsyncpa [#allocation18], 1 }

</bundles_post_ra>
